<compile_context>
chip_gen: v6e
topology: v6e:2x2x1
jax: 0.10.0
libtpu: 0.0.40
codegen_flags: <defaults>
</compile_context>

<pallas_src>
import jax
import jax.numpy as jnp
from jax import lax
from jax.experimental import pallas as pl
from jax.experimental.pallas import tpu as pltpu

LANE = 128


def _rup(n, m):
    return ((n + m - 1) // m) * m


def _pad_to(arr, shape):
    pads = [(0, s - d) for d, s in zip(arr.shape, shape)]
    return jnp.pad(arr, pads)


# ----------------------------------------------------------------------------
# Fused Pallas kernel (all blocks + head), one batch tile per grid step
# ----------------------------------------------------------------------------
def make_tcn_kernel(B_tile, Leff, layer_meta):
    """layer_meta: tuple of (K, dilation, has_downsample) per TemporalBlock."""
    M = B_tile * Leff
    leff_pow2 = (Leff & (Leff - 1)) == 0

    def kernel(*refs):
        x_ref = refs[0]
        out_ref = refs[-1]
        wrefs = refs[1:-1]

        # Fold batch into the matmul M dimension (single stacked matmul per conv).
        x = x_ref[...]                                    # (B_tile, Leff, C0_pad) f32
        h = x.reshape(M, x.shape[-1])                     # (M, C0_pad)

        def causal_conv(a, w_cat, b, K, d):
            # a: (M, C_pad) f32; w_cat: (K*C_pad, C_out_pad) bf16; b: (1, C_out_pad) f32
            # Per-row time index within its batch segment (mask = no cross-batch leak,
            # and the causal zeros at the segment start).
            t = lax.broadcasted_iota(jnp.int32, a.shape, 0)
            t = (t & (Leff - 1)) if leff_pow2 else (t % Leff)
            cols = []
            for j in range(K):
                s = (K - 1 - j) * d                       # causal shift of tap j
                if s == 0:
                    cols.append(a)
                else:
                    rolled = pltpu.roll(a, shift=s, axis=0)   # XLU sublane rotate
                    cols.append(jnp.where(t >= s, rolled, 0.0))
            stacked = cols[0] if K == 1 else jnp.concatenate(cols, axis=1)  # lane concat
            acc = jnp.dot(stacked.astype(jnp.bfloat16), w_cat,
                          preferred_element_type=jnp.float32)
            return acc + b                                # bias add in f32

        idx = 0
        for (K, d, has_ds) in layer_meta:
            w1 = wrefs[idx][...]
            b1 = wrefs[idx + 1][...]
            w2 = wrefs[idx + 2][...]
            b2 = wrefs[idx + 3][...]
            idx += 4

            h1 = jnp.maximum(causal_conv(h, w1, b1, K, d), 0.0)   # conv1 + chomp + ReLU
            # dropout1: identity (inference)
            h2 = jnp.maximum(causal_conv(h1, w2, b2, K, d), 0.0)  # conv2 + chomp + ReLU
            # dropout2: identity (inference)

            if has_ds:
                wd = wrefs[idx][...]
                bd = wrefs[idx + 1][...]
                idx += 2
                res = jnp.dot(h.astype(jnp.bfloat16), wd,
                              preferred_element_type=jnp.float32) + bd
            else:
                res = h
            h = jnp.maximum(h2 + res, 0.0)                # residual + final ReLU (f32)

        # Head: Linear on the LAST time step of each batch segment only.
        w_lin = wrefs[idx][...]
        b_lin = wrefs[idx + 1][...]
        rows = [h[(b + 1) * Leff - 1:(b + 1) * Leff, :] for b in range(B_tile)]
        y_last = rows[0] if B_tile == 1 else jnp.concatenate(rows, axis=0)  # (B_tile, C)
        out = jnp.dot(y_last.astype(jnp.bfloat16), w_lin,
                      preferred_element_type=jnp.float32) + b_lin
        out_ref[0] = out                                  # lane-dense (B_tile, out_pad) store

    return kernel


# ----------------------------------------------------------------------------
# Wrapper (glue)
# ----------------------------------------------------------------------------
def tcn_forward(x_ncl, params):
    """x_ncl: (B, C_in, L) NCL as in PyTorch. Returns (B, output_size)."""
    kp = params["kernel"]
    B, C_in, L = x_ncl.shape
    c0_pad = kp["c0_pad"]
    out_pad = kp["out_pad"]
    out_size = kp["out_size"]

    # channels-last + lane padding only (no time padding materialized in HBM)
    x_blc = jnp.transpose(x_ncl, (0, 2, 1)).astype(jnp.float32)
    x_blc = jnp.pad(x_blc, ((0, 0), (0, 0), (0, c0_pad - C_in)))

    # Final-timestep receptive field: only the last Leff steps can affect y[:, :, -1].
    rf = 1 + sum(2 * (layer["K"] - 1) * layer["dilation"] for layer in kp["layers"])
    Leff = min(L, _rup(rf, 8))        # multiple of 8 keeps the (B,L,C)->(B*L,C) merge layout-free
    if Leff < L:
        x_blc = x_blc[:, L - Leff:, :]

    # Fold the batch into M.  Keep 2 parallel tiles only when the batch is big enough
    # (keeps both v7x TensorCores busy); otherwise a single grid step.
    G = 2 if (B % 2 == 0 and B >= 4) else 1
    B_tile = B // G

    layer_meta = []
    weights = []
    in_specs = [pl.BlockSpec((B_tile, Leff, c0_pad), lambda g: (g, 0, 0))]

    def add_weight(arr):
        weights.append(arr)
        # Grid-invariant full-array VMEM block (same block index every step -> no re-DMA).
        # TODO(synk): pipeline_mode=pl.Buffered(1) would halve weight VMEM when channel
        #             counts grow; irrelevant at these sizes.
        in_specs.append(pl.BlockSpec(arr.shape, lambda g: (0, 0)))

    for layer in kp["layers"]:
        layer_meta.append((layer["K"], layer["dilation"], layer["wd"] is not None))
        add_weight(layer["w1"])
        add_weight(layer["b1"])
        add_weight(layer["w2"])
        add_weight(layer["b2"])
        if layer["wd"] is not None:
            add_weight(layer["wd"])
            add_weight(layer["bd"])
    add_weight(kp["w_lin"])
    add_weight(kp["b_lin"])

    kernel = make_tcn_kernel(B_tile, Leff, tuple(layer_meta))

    # Advisory cost estimate for XLA scheduling around the custom call.
    flops = 0
    bytes_accessed = int(x_blc.size) * 4 + B * out_pad * 4
    for w in weights:
        bytes_accessed += int(w.size) * w.dtype.itemsize
    for layer in kp["layers"]:
        flops += 2 * B * Leff * int(layer["w1"].shape[0]) * int(layer["w1"].shape[1])
        flops += 2 * B * Leff * int(layer["w2"].shape[0]) * int(layer["w2"].shape[1])
        if layer["wd"] is not None:
            flops += 2 * B * Leff * int(layer["wd"].shape[0]) * int(layer["wd"].shape[1])
    flops += 2 * B * int(kp["w_lin"].shape[0]) * int(kp["w_lin"].shape[1])

    out3 = pl.pallas_call(
        kernel,
        out_shape=jax.ShapeDtypeStruct((G, B_tile, out_pad), jnp.float32),
        grid=(G,),
        in_specs=in_specs,
        out_specs=pl.BlockSpec((1, B_tile, out_pad), lambda g: (g, 0, 0)),
        compiler_params=pltpu.CompilerParams(
            dimension_semantics=("parallel",),            # megacore sharding on v7x
            # 32 MiB is safe on every generation (v7x scoped default); raise toward
            # ~100 MiB on v5e/v6e if keeping whole-sequence residency for very long L.
            vmem_limit_bytes=32 * 1024 * 1024),
        cost_estimate=pl.CostEstimate(
            flops=int(flops), transcendentals=0, bytes_accessed=int(bytes_accessed)),
    )(x_blc, *weights)

    return out3.reshape(B, out_pad)[:, :out_size]


# ----------------------------------------------------------------------------
# Deterministic parameter init (mirrors module __init__ shapes)
# ----------------------------------------------------------------------------
def weight_norm_reparam(v):
    # v: (C_out, C_in, K).  PyTorch weight_norm: W = g * v / ||v||, g init = ||v||.
    norm = jnp.sqrt(jnp.sum(v * v, axis=(1, 2), keepdims=True))
    g = norm
    return g * v / (norm + 1e-12)


def init_params(key, input_size, output_size, num_channels, kernel_size):
    c0_pad = _rup(input_size, LANE)
    out_pad = _rup(output_size, LANE)

    ref_layers = []
    ker_layers = []
    in_ch = input_size
    for i, out_ch in enumerate(num_channels):
        d = 2 ** i
        key, k1, k2, k3, k4, k5, k6 = jax.random.split(key, 7)
        v1 = 0.01 * jax.random.normal(k1, (out_ch, in_ch, kernel_size), jnp.float32)
        v2 = 0.01 * jax.random.normal(k2, (out_ch, out_ch, kernel_size), jnp.float32)
        W1 = weight_norm_reparam(v1)
        W2 = weight_norm_reparam(v2)
        b1 = 0.05 * jax.random.normal(k3, (out_ch,), jnp.float32)
        b2 = 0.05 * jax.random.normal(k4, (out_ch,), jnp.float32)

        w1_t = jnp.transpose(W1, (2, 1, 0))     # (K, C_in, C_out) per-tap
        w2_t = jnp.transpose(W2, (2, 1, 0))     # (K, C_out, C_out)
        in_pad = _rup(in_ch, LANE)
        ch_pad = _rup(out_ch, LANE)

        ref_blk = {"dilation": d,
                   "w1": w1_t, "b1": b1.reshape(1, 1, out_ch),
                   "w2": w2_t, "b2": b2.reshape(1, 1, out_ch),
                   "wd": None, "bd": None}
        ker_blk = {
            "K": kernel_size, "dilation": d,
            # im2col-fused, lane-padded, bf16 MXU weights: (K*C_in_pad, C_out_pad)
            "w1": _pad_to(w1_t, (kernel_size, in_pad, ch_pad)).reshape(
                kernel_size * in_pad, ch_pad).astype(jnp.bfloat16),
            "b1": _pad_to(b1.reshape(1, out_ch), (1, ch_pad)),        # f32 bias
            "w2": _pad_to(w2_t, (kernel_size, ch_pad, ch_pad)).reshape(
                kernel_size * ch_pad, ch_pad).astype(jnp.bfloat16),
            "b2": _pad_to(b2.reshape(1, out_ch), (1, ch_pad)),
            "wd": None, "bd": None,
        }
        if in_ch != out_ch:  # downsample 1x1 conv
            Wd = 0.01 * jax.random.normal(k5, (out_ch, in_ch), jnp.float32)
            bd = 0.05 * jax.random.normal(k6, (out_ch,), jnp.float32)
            ref_blk["wd"] = Wd.T                               # (C_in, C_out)
            ref_blk["bd"] = bd.reshape(1, 1, out_ch)
            ker_blk["wd"] = _pad_to(Wd.T, (in_pad, ch_pad)).astype(jnp.bfloat16)
            ker_blk["bd"] = _pad_to(bd.reshape(1, out_ch), (1, ch_pad))
        ref_layers.append(ref_blk)
        ker_layers.append(ker_blk)
        in_ch = out_ch

    key, k7, k8 = jax.random.split(key, 3)
    W_lin = 0.01 * jax.random.normal(k7, (output_size, num_channels[-1]), jnp.float32)
    b_lin = 0.05 * jax.random.normal(k8, (output_size,), jnp.float32)
    c_last_pad = _rup(num_channels[-1], LANE)

    return {
        "ref": {"blocks": ref_layers,
                "w_lin": W_lin.T,                              # (C_last, output_size)
                "b_lin": b_lin.reshape(1, output_size)},
        "kernel": {"layers": ker_layers,
                   "w_lin": _pad_to(W_lin.T, (c_last_pad, out_pad)).astype(jnp.bfloat16),
                   "b_lin": _pad_to(b_lin.reshape(1, output_size), (1, out_pad)),
                   "c0_pad": c0_pad, "out_pad": out_pad, "out_size": output_size},
    }


# ----------------------------------------------------------------------------
# Pure-JAX reference (same math, f32, no Pallas, unpadded, full sequence)
# ----------------------------------------------------------------------------
def reference_forward(x_ncl, ref_params):
    y = jnp.transpose(x_ncl, (0, 2, 1)).astype(jnp.float32)
    for blk in ref_params["blocks"]:
        B, L, _ = y.shape
        K = blk["w1"].shape[0]
        d = blk["dilation"]
        p = (K - 1) * d

        def causal_conv(h, w_taps, b):
            hp = jnp.pad(h, ((0, 0), (p, 0), (0, 0)))
            acc = sum(jnp.dot(hp[:, j * d: j * d + L, :], w_taps[j]) for j in range(K))
            return acc + b

        h = jax.nn.relu(causal_conv(y, blk["w1"], blk["b1"]))
        out = jax.nn.relu(causal_conv(h, blk["w2"], blk["b2"]))
        res = y if blk["wd"] is None else jnp.dot(y, blk["wd"]) + blk["bd"]
        y = jax.nn.relu(out + res)
    return jnp.dot(y[:, -1, :], ref_params["w_lin"]) + ref_params["b_lin"]


# ----------------------------------------------------------------------------
if __name__ == "__main__":
    # Small shapes consistent with the module: x is (batch, input_size, seq_len)
    B, C_IN, L = 2, 4, 16
    OUTPUT_SIZE = 5
    NUM_CHANNELS = [8, 8]
    KERNEL_SIZE = 3
    DROPOUT = 0.2  # identity at inference

    key = jax.random.PRNGKey(0)
    key, kx = jax.random.split(key)
    x = jax.random.normal(kx, (B, C_IN, L), jnp.float32)

    params = init_params(key, C_IN, OUTPUT_SIZE, NUM_CHANNELS, KERNEL_SIZE)

    out = jax.block_until_ready(tcn_forward(x, params))
    ref = jax.block_until_ready(reference_forward(x, params["ref"]))

    assert out.shape == (B, OUTPUT_SIZE)
    # bf16 MXU operands -> slightly looser tolerance than the pure-f32 reference.
    assert jnp.allclose(out, ref, rtol=2e-2, atol=2e-3), (out, ref)

    print("KERNEL_OK")
</pallas_src>

<mosaic_0001>
module attributes {stable_mosaic.version = 11 : i64} {
  func.func @kernel(%arg0: i32, %arg1: memref<2x16x128xf32, #tpu.memory_space<vmem>>, %arg2: memref<384x128xbf16, #tpu.memory_space<vmem>>, %arg3: memref<1x128xf32, #tpu.memory_space<vmem>>, %arg4: memref<384x128xbf16, #tpu.memory_space<vmem>>, %arg5: memref<1x128xf32, #tpu.memory_space<vmem>>, %arg6: memref<128x128xbf16, #tpu.memory_space<vmem>>, %arg7: memref<1x128xf32, #tpu.memory_space<vmem>>, %arg8: memref<384x128xbf16, #tpu.memory_space<vmem>>, %arg9: memref<1x128xf32, #tpu.memory_space<vmem>>, %arg10: memref<384x128xbf16, #tpu.memory_space<vmem>>, %arg11: memref<1x128xf32, #tpu.memory_space<vmem>>, %arg12: memref<128x128xbf16, #tpu.memory_space<vmem>>, %arg13: memref<1x128xf32, #tpu.memory_space<vmem>>, %arg14: memref<1x2x128xf32, #tpu.memory_space<vmem>>) attributes {dimension_semantics = [#tpu.dimension_semantics<parallel>], iteration_bounds = array<i64: 1>, scalar_prefetch = 0 : i64, scratch_operands = 0 : i64, tpu.core_type = #tpu.core_type<tc>, window_params = [{transform_indices = @transform_0, window_bounds = array<i64: 2, 16, 128>}, {pipeline_mode = #tpu.pipeline_mode<synchronous>, transform_indices = @transform_1, window_bounds = array<i64: 384, 128>}, {pipeline_mode = #tpu.pipeline_mode<synchronous>, transform_indices = @transform_2, window_bounds = array<i64: 1, 128>}, {pipeline_mode = #tpu.pipeline_mode<synchronous>, transform_indices = @transform_3, window_bounds = array<i64: 384, 128>}, {pipeline_mode = #tpu.pipeline_mode<synchronous>, transform_indices = @transform_4, window_bounds = array<i64: 1, 128>}, {pipeline_mode = #tpu.pipeline_mode<synchronous>, transform_indices = @transform_5, window_bounds = array<i64: 128, 128>}, {pipeline_mode = #tpu.pipeline_mode<synchronous>, transform_indices = @transform_6, window_bounds = array<i64: 1, 128>}, {pipeline_mode = #tpu.pipeline_mode<synchronous>, transform_indices = @transform_7, window_bounds = array<i64: 384, 128>}, {pipeline_mode = #tpu.pipeline_mode<synchronous>, transform_indices = @transform_8, window_bounds = array<i64: 1, 128>}, {pipeline_mode = #tpu.pipeline_mode<synchronous>, transform_indices = @transform_9, window_bounds = array<i64: 384, 128>}, {pipeline_mode = #tpu.pipeline_mode<synchronous>, transform_indices = @transform_10, window_bounds = array<i64: 1, 128>}, {pipeline_mode = #tpu.pipeline_mode<synchronous>, transform_indices = @transform_11, window_bounds = array<i64: 128, 128>}, {pipeline_mode = #tpu.pipeline_mode<synchronous>, transform_indices = @transform_12, window_bounds = array<i64: 1, 128>}, {transform_indices = @transform_13, window_bounds = array<i64: 1, 2, 128>}]} {
    %c0 = arith.constant 0 : index
    %c0_0 = arith.constant 0 : index
    %c0_1 = arith.constant 0 : index
    %0 = vector.load %arg1[%c0, %c0_0, %c0_1] : memref<2x16x128xf32, #tpu.memory_space<vmem>>, vector<2x16x128xf32>
    %1 = vector.shape_cast %0 : vector<2x16x128xf32> to vector<32x128xf32>
    %c0_2 = arith.constant 0 : index
    %c0_3 = arith.constant 0 : index
    %2 = vector.load %arg2[%c0_2, %c0_3] : memref<384x128xbf16, #tpu.memory_space<vmem>>, vector<384x128xbf16>
    %c0_4 = arith.constant 0 : index
    %c0_5 = arith.constant 0 : index
    %3 = vector.load %arg3[%c0_4, %c0_5] : memref<1x128xf32, #tpu.memory_space<vmem>>, vector<1x128xf32>
    %c0_6 = arith.constant 0 : index
    %c0_7 = arith.constant 0 : index
    %4 = vector.load %arg4[%c0_6, %c0_7] : memref<384x128xbf16, #tpu.memory_space<vmem>>, vector<384x128xbf16>
    %c0_8 = arith.constant 0 : index
    %c0_9 = arith.constant 0 : index
    %5 = vector.load %arg5[%c0_8, %c0_9] : memref<1x128xf32, #tpu.memory_space<vmem>>, vector<1x128xf32>
    %6 = tpu.iota {dimensions = array<i32: 0>} : vector<32x128xi32>
    %c15_i32 = arith.constant 15 : i32
    %7 = vector.broadcast %c15_i32 : i32 to vector<32x128xi32>
    %8 = arith.andi %6, %7 : vector<32x128xi32>
    %c2_i32 = arith.constant 2 : i32
    %9 = tpu.dynamic_rotate %1 by %c2_i32 dim 0 : vector<32x128xf32>, i32 -> vector<32x128xf32>
    %c2_i32_10 = arith.constant 2 : i32
    %10 = vector.broadcast %c2_i32_10 : i32 to vector<32x128xi32>
    %11 = arith.cmpi sge, %8, %10 : vector<32x128xi32>
    %cst = arith.constant 0.000000e+00 : f32
    %12 = vector.broadcast %cst : f32 to vector<32x128xf32>
    %13 = arith.select %11, %9, %12 : vector<32x128xi1>, vector<32x128xf32>
    %c1_i32 = arith.constant 1 : i32
    %14 = tpu.dynamic_rotate %1 by %c1_i32 dim 0 : vector<32x128xf32>, i32 -> vector<32x128xf32>
    %c1_i32_11 = arith.constant 1 : i32
    %15 = vector.broadcast %c1_i32_11 : i32 to vector<32x128xi32>
    %16 = arith.cmpi sge, %8, %15 : vector<32x128xi32>
    %cst_12 = arith.constant 0.000000e+00 : f32
    %17 = vector.broadcast %cst_12 : f32 to vector<32x128xf32>
    %18 = arith.select %16, %14, %17 : vector<32x128xi1>, vector<32x128xf32>
    %19 = tpu.concatenate %13, %18, %1 in 1 : vector<32x128xf32>, vector<32x128xf32>, vector<32x128xf32> -> vector<32x384xf32>
    %20 = arith.truncf %19 : vector<32x384xf32> to vector<32x384xbf16>
    %cst_13 = arith.constant dense<0.000000e+00> : vector<32x128xf32>
    %21 = tpu.matmul %20, %2, %cst_13 {dimension_numbers = #tpu.dot_dimension_numbers<[1], [0], [0], [1], [0, 0, 1, 1], [], []>} : vector<32x384xbf16>, vector<384x128xbf16>, vector<32x128xf32> -> vector<32x128xf32>
    %22 = vector.broadcast %3 : vector<1x128xf32> to vector<32x128xf32>
    %23 = arith.addf %21, %22 : vector<32x128xf32>
    %cst_14 = arith.constant 0.000000e+00 : f32
    %24 = vector.broadcast %cst_14 : f32 to vector<32x128xf32>
    %25 = arith.maximumf %23, %24 : vector<32x128xf32>
    %26 = tpu.iota {dimensions = array<i32: 0>} : vector<32x128xi32>
    %c15_i32_15 = arith.constant 15 : i32
    %27 = vector.broadcast %c15_i32_15 : i32 to vector<32x128xi32>
    %28 = arith.andi %26, %27 : vector<32x128xi32>
    %c2_i32_16 = arith.constant 2 : i32
    %29 = tpu.dynamic_rotate %25 by %c2_i32_16 dim 0 : vector<32x128xf32>, i32 -> vector<32x128xf32>
    %c2_i32_17 = arith.constant 2 : i32
    %30 = vector.broadcast %c2_i32_17 : i32 to vector<32x128xi32>
    %31 = arith.cmpi sge, %28, %30 : vector<32x128xi32>
    %cst_18 = arith.constant 0.000000e+00 : f32
    %32 = vector.broadcast %cst_18 : f32 to vector<32x128xf32>
    %33 = arith.select %31, %29, %32 : vector<32x128xi1>, vector<32x128xf32>
    %c1_i32_19 = arith.constant 1 : i32
    %34 = tpu.dynamic_rotate %25 by %c1_i32_19 dim 0 : vector<32x128xf32>, i32 -> vector<32x128xf32>
    %c1_i32_20 = arith.constant 1 : i32
    %35 = vector.broadcast %c1_i32_20 : i32 to vector<32x128xi32>
    %36 = arith.cmpi sge, %28, %35 : vector<32x128xi32>
    %cst_21 = arith.constant 0.000000e+00 : f32
    %37 = vector.broadcast %cst_21 : f32 to vector<32x128xf32>
    %38 = arith.select %36, %34, %37 : vector<32x128xi1>, vector<32x128xf32>
    %39 = tpu.concatenate %33, %38, %25 in 1 : vector<32x128xf32>, vector<32x128xf32>, vector<32x128xf32> -> vector<32x384xf32>
    %40 = arith.truncf %39 : vector<32x384xf32> to vector<32x384xbf16>
    %cst_22 = arith.constant dense<0.000000e+00> : vector<32x128xf32>
    %41 = tpu.matmul %40, %4, %cst_22 {dimension_numbers = #tpu.dot_dimension_numbers<[1], [0], [0], [1], [0, 0, 1, 1], [], []>} : vector<32x384xbf16>, vector<384x128xbf16>, vector<32x128xf32> -> vector<32x128xf32>
    %42 = vector.broadcast %5 : vector<1x128xf32> to vector<32x128xf32>
    %43 = arith.addf %41, %42 : vector<32x128xf32>
    %cst_23 = arith.constant 0.000000e+00 : f32
    %44 = vector.broadcast %cst_23 : f32 to vector<32x128xf32>
    %45 = arith.maximumf %43, %44 : vector<32x128xf32>
    %c0_24 = arith.constant 0 : index
    %c0_25 = arith.constant 0 : index
    %46 = vector.load %arg6[%c0_24, %c0_25] : memref<128x128xbf16, #tpu.memory_space<vmem>>, vector<128x128xbf16>
    %c0_26 = arith.constant 0 : index
    %c0_27 = arith.constant 0 : index
    %47 = vector.load %arg7[%c0_26, %c0_27] : memref<1x128xf32, #tpu.memory_space<vmem>>, vector<1x128xf32>
    %48 = arith.truncf %1 : vector<32x128xf32> to vector<32x128xbf16>
    %cst_28 = arith.constant dense<0.000000e+00> : vector<32x128xf32>
    %49 = tpu.matmul %48, %46, %cst_28 {dimension_numbers = #tpu.dot_dimension_numbers<[1], [0], [0], [1], [0, 0, 1, 1], [], []>} : vector<32x128xbf16>, vector<128x128xbf16>, vector<32x128xf32> -> vector<32x128xf32>
    %50 = vector.broadcast %47 : vector<1x128xf32> to vector<32x128xf32>
    %51 = arith.addf %49, %50 : vector<32x128xf32>
    %52 = arith.addf %45, %51 : vector<32x128xf32>
    %cst_29 = arith.constant 0.000000e+00 : f32
    %53 = vector.broadcast %cst_29 : f32 to vector<32x128xf32>
    %54 = arith.maximumf %52, %53 : vector<32x128xf32>
    %c0_30 = arith.constant 0 : index
    %c0_31 = arith.constant 0 : index
    %55 = vector.load %arg8[%c0_30, %c0_31] : memref<384x128xbf16, #tpu.memory_space<vmem>>, vector<384x128xbf16>
    %c0_32 = arith.constant 0 : index
    %c0_33 = arith.constant 0 : index
    %56 = vector.load %arg9[%c0_32, %c0_33] : memref<1x128xf32, #tpu.memory_space<vmem>>, vector<1x128xf32>
    %c0_34 = arith.constant 0 : index
    %c0_35 = arith.constant 0 : index
    %57 = vector.load %arg10[%c0_34, %c0_35] : memref<384x128xbf16, #tpu.memory_space<vmem>>, vector<384x128xbf16>
    %c0_36 = arith.constant 0 : index
    %c0_37 = arith.constant 0 : index
    %58 = vector.load %arg11[%c0_36, %c0_37] : memref<1x128xf32, #tpu.memory_space<vmem>>, vector<1x128xf32>
    %59 = tpu.iota {dimensions = array<i32: 0>} : vector<32x128xi32>
    %c15_i32_38 = arith.constant 15 : i32
    %60 = vector.broadcast %c15_i32_38 : i32 to vector<32x128xi32>
    %61 = arith.andi %59, %60 : vector<32x128xi32>
    %c4_i32 = arith.constant 4 : i32
    %62 = tpu.dynamic_rotate %54 by %c4_i32 dim 0 : vector<32x128xf32>, i32 -> vector<32x128xf32>
    %c4_i32_39 = arith.constant 4 : i32
    %63 = vector.broadcast %c4_i32_39 : i32 to vector<32x128xi32>
    %64 = arith.cmpi sge, %61, %63 : vector<32x128xi32>
    %cst_40 = arith.constant 0.000000e+00 : f32
    %65 = vector.broadcast %cst_40 : f32 to vector<32x128xf32>
    %66 = arith.select %64, %62, %65 : vector<32x128xi1>, vector<32x128xf32>
    %c2_i32_41 = arith.constant 2 : i32
    %67 = tpu.dynamic_rotate %54 by %c2_i32_41 dim 0 : vector<32x128xf32>, i32 -> vector<32x128xf32>
    %c2_i32_42 = arith.constant 2 : i32
    %68 = vector.broadcast %c2_i32_42 : i32 to vector<32x128xi32>
    %69 = arith.cmpi sge, %61, %68 : vector<32x128xi32>
    %cst_43 = arith.constant 0.000000e+00 : f32
    %70 = vector.broadcast %cst_43 : f32 to vector<32x128xf32>
    %71 = arith.select %69, %67, %70 : vector<32x128xi1>, vector<32x128xf32>
    %72 = tpu.concatenate %66, %71, %54 in 1 : vector<32x128xf32>, vector<32x128xf32>, vector<32x128xf32> -> vector<32x384xf32>
    %73 = arith.truncf %72 : vector<32x384xf32> to vector<32x384xbf16>
    %cst_44 = arith.constant dense<0.000000e+00> : vector<32x128xf32>
    %74 = tpu.matmul %73, %55, %cst_44 {dimension_numbers = #tpu.dot_dimension_numbers<[1], [0], [0], [1], [0, 0, 1, 1], [], []>} : vector<32x384xbf16>, vector<384x128xbf16>, vector<32x128xf32> -> vector<32x128xf32>
    %75 = vector.broadcast %56 : vector<1x128xf32> to vector<32x128xf32>
    %76 = arith.addf %74, %75 : vector<32x128xf32>
    %cst_45 = arith.constant 0.000000e+00 : f32
    %77 = vector.broadcast %cst_45 : f32 to vector<32x128xf32>
    %78 = arith.maximumf %76, %77 : vector<32x128xf32>
    %79 = tpu.iota {dimensions = array<i32: 0>} : vector<32x128xi32>
    %c15_i32_46 = arith.constant 15 : i32
    %80 = vector.broadcast %c15_i32_46 : i32 to vector<32x128xi32>
    %81 = arith.andi %79, %80 : vector<32x128xi32>
    %c4_i32_47 = arith.constant 4 : i32
    %82 = tpu.dynamic_rotate %78 by %c4_i32_47 dim 0 : vector<32x128xf32>, i32 -> vector<32x128xf32>
    %c4_i32_48 = arith.constant 4 : i32
    %83 = vector.broadcast %c4_i32_48 : i32 to vector<32x128xi32>
    %84 = arith.cmpi sge, %81, %83 : vector<32x128xi32>
    %cst_49 = arith.constant 0.000000e+00 : f32
    %85 = vector.broadcast %cst_49 : f32 to vector<32x128xf32>
    %86 = arith.select %84, %82, %85 : vector<32x128xi1>, vector<32x128xf32>
    %c2_i32_50 = arith.constant 2 : i32
    %87 = tpu.dynamic_rotate %78 by %c2_i32_50 dim 0 : vector<32x128xf32>, i32 -> vector<32x128xf32>
    %c2_i32_51 = arith.constant 2 : i32
    %88 = vector.broadcast %c2_i32_51 : i32 to vector<32x128xi32>
    %89 = arith.cmpi sge, %81, %88 : vector<32x128xi32>
    %cst_52 = arith.constant 0.000000e+00 : f32
    %90 = vector.broadcast %cst_52 : f32 to vector<32x128xf32>
    %91 = arith.select %89, %87, %90 : vector<32x128xi1>, vector<32x128xf32>
    %92 = tpu.concatenate %86, %91, %78 in 1 : vector<32x128xf32>, vector<32x128xf32>, vector<32x128xf32> -> vector<32x384xf32>
    %93 = arith.truncf %92 : vector<32x384xf32> to vector<32x384xbf16>
    %cst_53 = arith.constant dense<0.000000e+00> : vector<32x128xf32>
    %94 = tpu.matmul %93, %57, %cst_53 {dimension_numbers = #tpu.dot_dimension_numbers<[1], [0], [0], [1], [0, 0, 1, 1], [], []>} : vector<32x384xbf16>, vector<384x128xbf16>, vector<32x128xf32> -> vector<32x128xf32>
    %95 = vector.broadcast %58 : vector<1x128xf32> to vector<32x128xf32>
    %96 = arith.addf %94, %95 : vector<32x128xf32>
    %cst_54 = arith.constant 0.000000e+00 : f32
    %97 = vector.broadcast %cst_54 : f32 to vector<32x128xf32>
    %98 = arith.maximumf %96, %97 : vector<32x128xf32>
    %99 = arith.addf %98, %54 : vector<32x128xf32>
    %cst_55 = arith.constant 0.000000e+00 : f32
    %100 = vector.broadcast %cst_55 : f32 to vector<32x128xf32>
    %101 = arith.maximumf %99, %100 : vector<32x128xf32>
    %c0_56 = arith.constant 0 : index
    %c0_57 = arith.constant 0 : index
    %102 = vector.load %arg12[%c0_56, %c0_57] : memref<128x128xbf16, #tpu.memory_space<vmem>>, vector<128x128xbf16>
    %c0_58 = arith.constant 0 : index
    %c0_59 = arith.constant 0 : index
    %103 = vector.load %arg13[%c0_58, %c0_59] : memref<1x128xf32, #tpu.memory_space<vmem>>, vector<1x128xf32>
    %104 = vector.extract_strided_slice %101 {offsets = [15, 0], sizes = [1, 128], strides = [1, 1]} : vector<32x128xf32> to vector<1x128xf32>
    %105 = vector.extract_strided_slice %101 {offsets = [31, 0], sizes = [1, 128], strides = [1, 1]} : vector<32x128xf32> to vector<1x128xf32>
    %106 = tpu.concatenate %104, %105 in 0 : vector<1x128xf32>, vector<1x128xf32> -> vector<2x128xf32>
    %107 = arith.truncf %106 : vector<2x128xf32> to vector<2x128xbf16>
    %cst_60 = arith.constant dense<0.000000e+00> : vector<2x128xf32>
    %108 = tpu.matmul %107, %102, %cst_60 {dimension_numbers = #tpu.dot_dimension_numbers<[1], [0], [0], [1], [0, 0, 1, 1], [], []>} : vector<2x128xbf16>, vector<128x128xbf16>, vector<2x128xf32> -> vector<2x128xf32>
    %109 = vector.broadcast %103 : vector<1x128xf32> to vector<2x128xf32>
    %110 = arith.addf %108, %109 : vector<2x128xf32>
    %c0_61 = arith.constant 0 : index
    %c0_62 = arith.constant 0 : index
    %c0_63 = arith.constant 0 : index
    %111 = vector.load %arg14[%c0_61, %c0_62, %c0_63] : memref<1x2x128xf32, #tpu.memory_space<vmem>>, vector<1x2x128xf32>
    %112 = vector.shape_cast %111 : vector<1x2x128xf32> to vector<2x128xf32>
    %113 = vector.shape_cast %110 : vector<2x128xf32> to vector<1x2x128xf32>
    tpu.vector_store %arg14[%c0_61, %c0_62, %c0_63], %113 {strides = array<i32>} : memref<1x2x128xf32, #tpu.memory_space<vmem>>, vector<1x2x128xf32>,
    return
  }
  func.func @transform_0(%arg0: i32) -> (i32, i32, i32) {
    %c0_i32 = arith.constant 0 : i32
    %c0_i32_0 = arith.constant 0 : i32
    %c0_i32_1 = arith.constant 0 : i32
    return %arg0, %c0_i32, %c0_i32_0 : i32, i32, i32
  }
  func.func @transform_1(%arg0: i32) -> (i32, i32) {
    %c0_i32 = arith.constant 0 : i32
    %c0_i32_0 = arith.constant 0 : i32
    %c0_i32_1 = arith.constant 0 : i32
    return %c0_i32, %c0_i32_0 : i32, i32
  }
  func.func @transform_2(%arg0: i32) -> (i32, i32) {
    %c0_i32 = arith.constant 0 : i32
    %c0_i32_0 = arith.constant 0 : i32
    %c0_i32_1 = arith.constant 0 : i32
    return %c0_i32, %c0_i32_0 : i32, i32
  }
  func.func @transform_3(%arg0: i32) -> (i32, i32) {
    %c0_i32 = arith.constant 0 : i32
    %c0_i32_0 = arith.constant 0 : i32
    %c0_i32_1 = arith.constant 0 : i32
    return %c0_i32, %c0_i32_0 : i32, i32
  }
  func.func @transform_4(%arg0: i32) -> (i32, i32) {
    %c0_i32 = arith.constant 0 : i32
    %c0_i32_0 = arith.constant 0 : i32
    %c0_i32_1 = arith.constant 0 : i32
    return %c0_i32, %c0_i32_0 : i32, i32
  }
  func.func @transform_5(%arg0: i32) -> (i32, i32) {
    %c0_i32 = arith.constant 0 : i32
    %c0_i32_0 = arith.constant 0 : i32
    %c0_i32_1 = arith.constant 0 : i32
    return %c0_i32, %c0_i32_0 : i32, i32
  }
  func.func @transform_6(%arg0: i32) -> (i32, i32) {
    %c0_i32 = arith.constant 0 : i32
    %c0_i32_0 = arith.constant 0 : i32
    %c0_i32_1 = arith.constant 0 : i32
    return %c0_i32, %c0_i32_0 : i32, i32
  }
  func.func @transform_7(%arg0: i32) -> (i32, i32) {
    %c0_i32 = arith.constant 0 : i32
    %c0_i32_0 = arith.constant 0 : i32
    %c0_i32_1 = arith.constant 0 : i32
    return %c0_i32, %c0_i32_0 : i32, i32
  }
  func.func @transform_8(%arg0: i32) -> (i32, i32) {
    %c0_i32 = arith.constant 0 : i32
    %c0_i32_0 = arith.constant 0 : i32
    %c0_i32_1 = arith.constant 0 : i32
    return %c0_i32, %c0_i32_0 : i32, i32
  }
  func.func @transform_9(%arg0: i32) -> (i32, i32) {
    %c0_i32 = arith.constant 0 : i32
    %c0_i32_0 = arith.constant 0 : i32
    %c0_i32_1 = arith.constant 0 : i32
    return %c0_i32, %c0_i32_0 : i32, i32
  }
  func.func @transform_10(%arg0: i32) -> (i32, i32) {
    %c0_i32 = arith.constant 0 : i32
    %c0_i32_0 = arith.constant 0 : i32
    %c0_i32_1 = arith.constant 0 : i32
    return %c0_i32, %c0_i32_0 : i32, i32
  }
  func.func @transform_11(%arg0: i32) -> (i32, i32) {
    %c0_i32 = arith.constant 0 : i32
    %c0_i32_0 = arith.constant 0 : i32
    %c0_i32_1 = arith.constant 0 : i32
    return %c0_i32, %c0_i32_0 : i32, i32
  }
  func.func @transform_12(%arg0: i32) -> (i32, i32) {
    %c0_i32 = arith.constant 0 : i32
    %c0_i32_0 = arith.constant 0 : i32
    %c0_i32_1 = arith.constant 0 : i32
    return %c0_i32, %c0_i32_0 : i32, i32
  }
  func.func @transform_13(%arg0: i32) -> (i32, i32, i32) {
    %c0_i32 = arith.constant 0 : i32
    %c0_i32_0 = arith.constant 0 : i32
    %c0_i32_1 = arith.constant 0 : i32
    return %arg0, %c0_i32, %c0_i32_0 : i32, i32, i32
  }
}

</mosaic_0001>

<bundles_post_ra>
// kernel: tpu_custom_call.1
= control target key start
LH: loop header
LB: loop body
LE: loop exit
PB: predicated region body
PF: predicated region fallthrough
CT: control target
= control target key end

     0   :  { %18 = vsyncpa [#allocation3], 0  ;;  %s2832_s0 = inlined_call_operand.hbm [shape: f32[2,16,128], index: 0, kind: input, shape index: {}]   ;;  %s2833_s1 = inlined_call_operand.hbm [shape: bf16[384,128], index: 1, kind: input, shape index: {}]   ;;  %s2834_s2 = inlined_call_operand.vmem [shape: f32[1,128], index: 2, kind: input, shape index: {}]   ;;  %s2835_s3 = inlined_call_operand.hbm [shape: bf16[384,128], index: 3, kind: input, shape index: {}]   ;;  %s2836_s4 = inlined_call_operand.vmem [shape: f32[1,128], index: 4, kind: input, shape index: {}]   ;;  %s2837_s5 = inlined_call_operand.hbm [shape: bf16[128,128], index: 5, kind: input, shape index: {}]   ;;  %s2838_s6 = inlined_call_operand.vmem [shape: f32[1,128], index: 6, kind: input, shape index: {}]   ;;  %s2839_s7 = inlined_call_operand.hbm [shape: bf16[384,128], index: 7, kind: input, shape index: {}]   ;;  %s2840_s8 = inlined_call_operand.vmem [shape: f32[1,128], index: 8, kind: input, shape index: {}]   ;;  %s2841_s9 = inlined_call_operand.hbm [shape: bf16[384,128], index: 9, kind: input, shape index: {}]   ;;  %s2842_s10 = inlined_call_operand.vmem [shape: f32[1,128], index: 10, kind: input, shape index: {}]   ;;  %s2843_s11 = inlined_call_operand.hbm [shape: bf16[128,128], index: 11, kind: input, shape index: {}]   ;;  %s2844_s12 = inlined_call_operand.vmem [shape: f32[1,128], index: 12, kind: input, shape index: {}]   ;;  %s2845_s13 = inlined_call_operand.hbm [shape: f32[1,2,128], index: 13, kind: output, shape index: {}]  }
   0x1   :  { %19 = vsyncpa [#allocation6], 0 }
   0x2   :  { %20 = vsyncpa [#allocation9], 0 }
   0x3   :  { %21 = vsyncpa [#allocation12], 0 }
   0x4   :  { %22 = vsyncpa [#allocation4], 0  ;;  %s2512_s25 = smov [#allocation5]  }
   0x5   :  { %s40_s26 = sshll.u32 %s2512_s25, 4  ;;  %s41_s26 = int_to_ptr.vmem [resolvable:$true] %s40_s26 }
   0x6   :  { %s2350_s27 = scalar_lea.vmem %s41_s26, 3072  ;;  %p2355_p1 = scmp.lt.s32.totalorder %s41_s26, %s41_s26 }
   0x7   :  { %p2351_p0 = scmp.ne.s32.totalorder %s41_s26, %s2350_s27  ;;  %p2356_p2 = scmp.lt.s32.totalorder %s2350_s27, %s2350_s27 }
   0x9   :  { %p2357_p3 = por %p2356_p2, %p2355_p1 }
   0xb   :  { %p2358_p4 = pnand %p2357_p3, %p2351_p0 }
   0xd   :  { %2361 = shalt.err (!%p2358_p4)
}
   0xe   :  { %s2513_s28 = smov 64   ;;  %s2514_s29 = smov 4  }
   0xf   :  { %46 = dma.hbm_to_vmem [thread:$0]  %s2833_s1, 3072, %s41_s26, [#allocation6], %s2513_s28, %s2513_s28, %s2514_s29  }
  0x10   :  { %s2515_s15 = smov [#allocation8]   ;;  %s2516_s17 = smov [#allocation11]  }
  0x11   :  { %s68_s16 = sshll.u32 %s2515_s15, 4  ;;  %s96_s18 = sshll.u32 %s2516_s17, 4  ;;  %s69_s16 = int_to_ptr.vmem [resolvable:$true] %s68_s16  ;;  %s97_s18 = int_to_ptr.vmem [resolvable:$true] %s96_s18 }
  0x12   :  { %s2370_s19 = scalar_lea.vmem %s69_s16, 1024  ;;  %p2375_p6 = scmp.lt.s32.totalorder %s69_s16, %s69_s16 }
  0x13   :  { %p2371_p5 = scmp.ne.s32.totalorder %s69_s16, %s2370_s19  ;;  %p2376_p7 = scmp.lt.s32.totalorder %s2370_s19, %s2370_s19 }
  0x15   :  { %p2377_p8 = por %p2376_p7, %p2375_p6 }
  0x17   :  { %p2378_p9 = pnand %p2377_p8, %p2371_p5 }
  0x19   :  { %2381 = shalt.err (!%p2378_p9)
}
  0x1a   :  { %74 = dma.hbm_to_vmem [thread:$0]  %s2837_s5, 1024, %s69_s16, [#allocation9], %s2513_s28, %s2513_s28, %s2514_s29  }
  0x1b   :  { %s2390_s1 = scalar_lea.vmem %s97_s18, 3072  ;;  %p2395_p11 = scmp.lt.s32.totalorder %s97_s18, %s97_s18 }
  0x1c   :  { %p2391_p10 = scmp.ne.s32.totalorder %s97_s18, %s2390_s1  ;;  %p2396_p12 = scmp.lt.s32.totalorder %s2390_s1, %s2390_s1 }
  0x1e   :  { %p2397_p13 = por %p2396_p12, %p2395_p11 }
  0x20   :  { %p2398_p0 = pnand %p2397_p13, %p2391_p10 }
  0x22   :  { %2401 = shalt.err (!%p2398_p0)
}
  0x23   :  { %102 = dma.hbm_to_vmem [thread:$0]  %s2841_s9, 3072, %s97_s18, [#allocation12], %s2513_s28, %s2513_s28, %s2514_s29  }
  0x24   :  { %s2517_s24 = smov [#allocation2]  }
  0x25   :  { %s28_s25 = sshll.u32 %s2517_s24, 4  ;;  %s29_s25 = int_to_ptr.vmem [resolvable:$true] %s28_s25 }
  0x26   :  { %s2410_s26 = scalar_lea.vmem %s29_s25, 512  ;;  %p2415_p2 = scmp.lt.s32.totalorder %s29_s25, %s29_s25 }
  0x27   :  { %p2411_p1 = scmp.ne.s32.totalorder %s29_s25, %s2410_s26  ;;  %p2416_p3 = scmp.lt.s32.totalorder %s2410_s26, %s2410_s26 }
  0x29   :  { %p2417_p4 = por %p2416_p3, %p2415_p2 }
  0x2b   :  { %p2418_p5 = pnand %p2417_p4, %p2411_p1 }
  0x2d   :  { %2421 = shalt.err (!%p2418_p5)
}
  0x2e   :  { %s2518_s5 = smov 128   ;;  %s2519_s27 = smov 8  }
  0x2f   :  { %34 = dma.hbm_to_vmem [thread:$0]  %s2832_s0, 512, %s29_s25, [#allocation3], %s2518_s5, %s2518_s5, %s2519_s27  }
  0x30   :  { %s2520_s15 = smov [#allocation7]   ;;  %s2521_s17 = smov [#allocation10]  }
  0x31   :  { %s54_s16 = sshll.u32 %s2520_s15, 4  ;;  %s82_s9 = sshll.u32 %s2521_s17, 4  ;;  %s55_s16 = int_to_ptr.vmem [resolvable:$true] %s54_s16  ;;  %s83_s9 = int_to_ptr.vmem [resolvable:$true] %s82_s9 }
  0x32   :  { %s2430_s18 = scalar_lea.vmem %s55_s16, 3072  ;;  %p2435_p7 = scmp.lt.s32.totalorder %s55_s16, %s55_s16 }
  0x33   :  { %p2431_p6 = scmp.ne.s32.totalorder %s55_s16, %s2430_s18  ;;  %p2436_p8 = scmp.lt.s32.totalorder %s2430_s18, %s2430_s18 }
  0x35   :  { %p2437_p9 = por %p2436_p8, %p2435_p7 }
  0x37   :  { %p2438_p10 = pnand %p2437_p9, %p2431_p6 }
  0x39   :  { %2441 = shalt.err (!%p2438_p10)
}
  0x3a   :  { %60 = dma.hbm_to_vmem [thread:$0]  %s2835_s3, 3072, %s55_s16, [#allocation6], %s2513_s28, %s2513_s28, %s2514_s29  }
  0x3b   :  { %s2450_s0 = scalar_lea.vmem %s83_s9, 3072  ;;  %p2455_p12 = scmp.lt.s32.totalorder %s83_s9, %s83_s9 }
  0x3c   :  { %p2451_p11 = scmp.ne.s32.totalorder %s83_s9, %s2450_s0  ;;  %p2456_p13 = scmp.lt.s32.totalorder %s2450_s0, %s2450_s0 }
  0x3e   :  { %p2457_p0 = por %p2456_p13, %p2455_p12 }
  0x40   :  { %p2458_p1 = pnand %p2457_p0, %p2451_p11 }
  0x42   :  { %2461 = shalt.err (!%p2458_p1)
}
  0x43   :  { %88 = dma.hbm_to_vmem [thread:$0]  %s2839_s7, 3072, %s83_s9, [#allocation9], %s2513_s28, %s2513_s28, %s2514_s29  }
  0x44   :  { %s2522_s22 = smov [#allocation13]  }
  0x45   :  { %s110_s23 = sshll.u32 %s2522_s22, 4  ;;  %s111_s23 = int_to_ptr.vmem [resolvable:$true] %s110_s23 }
  0x46   :  { %s2470_s24 = scalar_lea.vmem %s111_s23, 1024  ;;  %p2475_p3 = scmp.lt.s32.totalorder %s111_s23, %s111_s23 }
  0x47   :  { %p2471_p2 = scmp.ne.s32.totalorder %s111_s23, %s2470_s24  ;;  %p2476_p4 = scmp.lt.s32.totalorder %s2470_s24, %s2470_s24 }
  0x49   :  { %p2477_p5 = por %p2476_p4, %p2475_p3 }
  0x4b   :  { %p2478_p6 = pnand %p2477_p5, %p2471_p2 }
  0x4d   :  { %2481 = shalt.err (!%p2478_p6)
}
  0x4e   :  { %116 = dma.hbm_to_vmem [thread:$0]  %s2843_s11, 1024, %s111_s23, [#allocation12], %s2513_s28, %s2513_s28, %s2514_s29  }
  0x4f   :  { %2502 = dma.done.wait [#allocation3], 512  }
  0x50   :  { %2503 = vsyncadd [#allocation3], 4294966784 }
  0x51   :  { %2504 = dma.done.wait [#allocation6], 6144  }
  0x52   :  { %2505 = vsyncadd [#allocation6], 4294961152 }
  0x53   :  { %2506 = dma.done.wait [#allocation9], 4096  }
  0x54   :  { %2507 = vsyncadd [#allocation9], 4294963200 }
  0x55   :  { %2508 = dma.done.wait [#allocation12], 4096  }
  0x56   :  { %2509 = vsyncadd [#allocation12], 4294963200  ;;  %v2230_v0 = vld [vmem:[#allocation5 + $0x78] sm:$0xff]   ;;  %v2232_v2 = vld [vmem:[#allocation5 + $0x70] sm:$0xff]   ;;  %v243_v10 = vlaneseq  ;;  %vm2523_vm5 = vmmov 1   ;;  %s2526_s30 = smov [#allocation14]  }
  0x57   :  { %v2231_v1 = vld [vmem:[#allocation5 + $0x38] sm:$0xff]   ;;  %1924 = vmatprep.subr.bf16.mxu0 %v2230_v0  ;;  %v2234_v4 = vld [vmem:[#allocation5 + $0x30] sm:$0xff]   ;;  %v2235_v5 = vld [vmem:[#allocation5 + $0x68] sm:$0xff]   ;;  %s1746_s14 = sshll.u32 %s2526_s30, 4  ;;  %s1747_s14 = int_to_ptr.vmem [resolvable:$true] %s1746_s14 }
  0x58   :  { %1925 = vmatpush3.bf16.msra.mxu0 %v2231_v1  ;;  %v2233_v3 = vld [vmem:[#allocation5 + $0xb8] sm:$0xff]   ;;  %v2236_v6 = vld [vmem:[#allocation5 + $0xb0] sm:$0xff]   ;;  %v2237_v7 = vld [vmem:[#allocation5 + $0x28] sm:$0xff]   ;;  %v2636_v14 = vshrl.u32 %v243_v10, 7  ;;  %s2482_s15 = scalar_lea.vmem %s1747_s14, 32  ;;  %p2487_p8 = scmp.lt.s32.totalorder %s1747_s14, %s1747_s14 }
  0x59   :  { %1926 = vmatprep.subr.bf16.mxu0 %v2232_v2  ;;  %2095 = vmatprep.subr.bf16.mxu1 %v2233_v3  ;;  %v2238_v8 = vld [vmem:[#allocation5 + $0x60] sm:$0xff]   ;;  %v2239_v9 = vld [vmem:[#allocation5 + $0xa8] sm:$0xff]   ;;  %v2241_v12 = vld [vmem:[#allocation5 + $0x58] sm:$0xff]   ;;  %p2483_p7 = scmp.ne.s32.totalorder %s1747_s14, %s2482_s15  ;;  %p2488_p9 = scmp.lt.s32.totalorder %s2482_s15, %s2482_s15 }
  0x5a   :  { %2096 = vmatpush3.bf16.msra.mxu1 %v2233_v3  ;;  %v2240_v11 = vld [vmem:[#allocation5 + $0x20] sm:$0xff]   ;;  %v2243_v15 = vld [vmem:[#allocation5 + $0x18] sm:$0xff]   ;;  %v246_v17 = vadd.s32 16, %v2636_v14  ;;  %v2244_v18 = vld [vmem:[#allocation5 + $0x50] sm:$0xff]   ;;  %v2640_v20 = vand.u32 15, %v2636_v14  ;;  %vm256_vm0 = vcmp.lt.s32.totalorder %v2636_v14, 2 }
  0x5b   :  { %2097 = vmatprep.subr.bf16.mxu1 %v2236_v6  ;;  %v2242_v13 = vld [vmem:[#allocation5 + $0xa0] sm:$0xff]   ;;  %v2245_v16 = vld [vmem:[#allocation5 + $0x98] sm:$0xff]   ;;  %v2246_v19 = vld [vmem:[#allocation5 + $0x10] sm:$0xff]   ;;  %vm273_vm2 = vcmp.lt.s32.totalorder %v2636_v14, 1  ;;  %vm1056_vm11 = vcmp.lt.s32.totalorder %v2636_v14, 4  ;;  %p2489_p10 = por %p2488_p9, %p2487_p8 }
  0x5c   :  { %1927 = vmatpush3.bf16.msra.mxu0 %v2234_v4  ;;  %v2248_v21 = vld [vmem:[#allocation5 + $0x90] sm:$0xff]   ;;  %v2642_v22 = vand.u32 15, %v246_v17  ;;  %v2247_v23 = vld [vmem:[#allocation5 + $0x48] sm:$0xff]   ;;  %v2250_v25 = vld [vmem:[#allocation5 + $0x40] sm:$0xff]   ;;  %vm278_vm1 = vcmp.ge.s32.totalorder %v2640_v20, 1  ;;  %vm261_vm3 = vcmp.ge.s32.totalorder %v2640_v20, 2 }
  0x5d   :  { %1928 = vmatprep.subr.bf16.mxu0 %v2235_v5  ;;  %v2249_v24 = vld [vmem:[#allocation5 + $0x8] sm:$0xff]   ;;  %v141_v27 = vld [vmem:[#allocation2] sm:$0xff]  ;;  %v144_v29 = vld [vmem:[#allocation2 + $0x18] sm:$0xff]  ;;  %vm1061_vm12 = vcmp.ge.s32.totalorder %v2640_v20, 4  ;;  %p2490_p11 = pnand %p2489_p10, %p2483_p7 }
  0x5e   :  { %2098 = vmatpush3.bf16.msra.mxu1 %v2236_v6  ;;  %v2251_v26 = vld [vmem:[#allocation5 + $0x88] sm:$0xff]   ;;  %vm280_vm4 = vcmp.ge.s32.totalorder %v2642_v22, 1  ;;  %v252_v30 = vrot.slane %v141_v27, 6  ;;  %v255_v32 = vrot.slane %v144_v29, 6  ;;  %v269_v33 = vrot.slane %v141_v27, 7  ;;  %v2252_v34 = vld [vmem:[#allocation5] sm:$0xff]   ;;  %vm2652_vm6 = vmpackc.low %vm2523_vm5, %vm278_vm1 }
  0x5f   :  { %2099 = vmatprep.subr.bf16.mxu1 %v2239_v9  ;;  %v142_v28 = vld [vmem:[#allocation2 + $0x8] sm:$0xff]  ;;  %v272_v36 = vrot.slane %v144_v29, 7  ;;  %vm2663_vm7 = vmpackc.low %vm2523_vm5, %vm261_vm3  ;;  %v143_v41 = vld [vmem:[#allocation2 + $0x10] sm:$0xff]  ;;  %vm263_vm9 = vcmp.ge.s32.totalorder %v2642_v22, 2  ;;  %vm1063_vm14 = vcmp.ge.s32.totalorder %v2642_v22, 4  ;;  %vm1642_vm1 = vcmask 1040384  }
  0x60   :  { %1929 = vmatpush3.bf16.msra.mxu0 %v2237_v7  ;;  %v253_v31 = vrot.slane %v142_v28, 6  ;;  %v270_v35 = vrot.slane %v142_v28, 7  ;;  %v2656_v38 = vpack.c.bf16 %v142_v28, %v141_v27  ;;  %v260_v44 = vsel %vm256_vm0, %v255_v32, %v252_v30  ;;  %v2253_v45 = vld [vmem:[#allocation5 + $0x80] sm:$0xff]   ;;  %vm2676_vm8 = vmpackc.low %vm2523_vm5, %vm280_vm4  ;;  %v2255_v49 = vld [vmem:[#allocation7 + $0x78] sm:$0xff]  }
  0x61   :  { %1930 = vmatprep.subr.bf16.mxu0 %v2238_v8  ;;  %v277_v43 = vsel %vm273_vm2, %v272_v36, %v269_v33  ;;  %v271_v48 = vrot.slane %v143_v41, 7  ;;  %v2254_v50 = vld [vmem:[#allocation7 + $0xb8] sm:$0xff]   ;;  %v254_v52 = vrot.slane %v143_v41, 6  ;;  %vm2691_vm10 = vmpackc.low %vm2523_vm5, %vm263_vm9  ;;  %v2695_v58 = vpack.c.bf16 %v144_v29, %v143_v41  ;;  %v2257_v59 = vld [vmem:[#allocation7 + $0xb0] sm:$0xff]  }
  0x62   :  { %2100 = vmatpush3.bf16.msra.mxu1 %v2239_v9  ;;  %v259_v39 = vsel %vm256_vm0, %v252_v30, %v253_v31  ;;  %v276_v42 = vsel %vm273_vm2, %v269_v33, %v270_v35  ;;  %2111 = vmatprep.mubr.bf16.mxu1 %v2656_v38  ;;  %v2256_v55 = vld [vmem:[#allocation7 + $0x38] sm:$0xff]   ;;  %v2258_v63 = vld [vmem:[#allocation7 + $0x70] sm:$0xff]   ;;  %v2260_v1 = vld [vmem:[#allocation7 + $0xa8] sm:$0xff]  }
  0x63   :  { %2101 = vmatprep.subr.bf16.mxu1 %v2242_v13  ;;  %v1784_v47 = vpack.c.bf16 %v276_v42, %v277_v43  ;;  %v1787_v51 = vpack.c.bf16 %v259_v39, %v260_v44  ;;  %v274_v53 = vsel %vm273_vm2, %v271_v48, %v272_v36  ;;  %v275_v54 = vsel %vm273_vm2, %v270_v35, %v271_v48  ;;  %v2259_v0 = vld [vmem:[#allocation7 + $0x30] sm:$0xff]   ;;  %v2261_v2 = vld [vmem:[#allocation7 + $0x68] sm:$0xff]   ;;  %v2263_v4 = vld [vmem:[#allocation7 + $0xa0] sm:$0xff]  }
  0x64   :  { %1931 = vmatpush3.bf16.msra.mxu0 %v2240_v11  ;;  %v1790_v56 = vpack.c.bf16 %v274_v53, %v275_v54  ;;  %v257_v60 = vsel %vm256_vm0, %v254_v52, %v255_v32  ;;  %v258_v61 = vsel %vm256_vm0, %v253_v31, %v254_v52  ;;  %v2262_v3 = vld [vmem:[#allocation7 + $0x28] sm:$0xff]   ;;  %v2264_v5 = vld [vmem:[#allocation7 + $0x60] sm:$0xff]   ;;  %v2266_v7 = vld [vmem:[#allocation7 + $0x98] sm:$0xff]  }
  0x65   :  { %1932 = vmatprep.subr.bf16.mxu0 %v2241_v12  ;;  %1785 = vmatprep.mubr.msk.bf16.mxu0 %vm2652_vm6, %v1784_v47  ;;  %v1793_v62 = vpack.c.bf16 %v257_v60, %v258_v61  ;;  %v2265_v6 = vld [vmem:[#allocation7 + $0x20] sm:$0xff]   ;;  %v2267_v8 = vld [vmem:[#allocation7 + $0x58] sm:$0xff]   ;;  %v2269_v10 = vld [vmem:[#allocation7 + $0x90] sm:$0xff]  }
  0x66   :  { %2102 = vmatpush3.bf16.msra.mxu1 %v2242_v13  ;;  %v2268_v9 = vld [vmem:[#allocation7 + $0x18] sm:$0xff]   ;;  %v2270_v11 = vld [vmem:[#allocation7 + $0x50] sm:$0xff]   ;;  %v2272_v13 = vld [vmem:[#allocation7 + $0x88] sm:$0xff]  }
  0x67   :  { %2103 = vmatprep.subr.bf16.mxu1 %v2245_v16  ;;  %v2271_v12 = vld [vmem:[#allocation7 + $0x10] sm:$0xff]   ;;  %v2275_v17 = vld [vmem:[#allocation7 + $0x80] sm:$0xff]   ;;  %v2282_v46 = vld [vmem:[#allocation8 + $0x18] sm:$0xff]  }
  0x68   :  { %1933 = vmatpush3.bf16.msra.mxu0 %v2243_v15  ;;  %v2273_v15 = vld [vmem:[#allocation7 + $0x48] sm:$0xff]   ;;  %v1758_v27 = vld [vmem:[%s2834_s2] ss:$0 sm:$0xff]  ;;  %vm2769_vm13 = vmpackc.low %vm2523_vm5, %vm1061_vm12 }
  0x69   :  { %1934 = vmatprep.subr.bf16.mxu0 %v2244_v18  ;;  %v2276_v18 = vld [vmem:[#allocation7 + $0x40] sm:$0xff]   ;;  %vm2788_vm15 = vmpackc.low %vm2523_vm5, %vm1063_vm14  ;;  %v2314_v22 = vld [vmem:[#allocation11 + $0x70] sm:$0xff]  }
  0x6a   :  { %2104 = vmatpush3.bf16.msra.mxu1 %v2245_v16  ;;  %v2274_v16 = vld [vmem:[#allocation7 + $0x8] sm:$0xff]   ;;  %v2334_v40 = vld [vmem:[#allocation13 + $0x38] sm:$0xff]  }
  0x6b   :  { %2105 = vmatprep.subr.bf16.mxu1 %v2248_v21  ;;  %v2336_v57 = vld [vmem:[#allocation13 + $0x28] sm:$0xff]   ;;  %v2338_v14 = vld [vmem:[#allocation13 + $0x18] sm:$0xff]  }
  0x6c   :  { %1935 = vmatpush3.bf16.msra.mxu0 %v2246_v19  ;;  %v2277_v19 = vld [vmem:[#allocation7] sm:$0xff]  }
  0x6d   :  { %1936 = vmatprep.subr.bf16.mxu0 %v2247_v23 }
  0x6e   :  { %2106 = vmatpush3.bf16.msra.mxu1 %v2248_v21  ;;  %v2278_v21 = vld [vmem:[#allocation8 + $0x38] sm:$0xff]  }
  0x6f   :  { %2107 = vmatprep.subr.bf16.mxu1 %v2251_v26 }
  0x70   :  { %1937 = vmatpush3.bf16.msra.mxu0 %v2249_v24 }
  0x71   :  { %1938 = vmatprep.subr.bf16.mxu0 %v2250_v25 }
  0x72   :  { %2108 = vmatpush3.bf16.msra.mxu1 %v2251_v26 }
  0x73   :  { %2109 = vmatprep.subr.bf16.mxu1 %v2253_v45 }
  0x74   :  { %1939 = vmatpush3.bf16.msra.mxu0 %v2252_v34 }
  0x75   :  { %1962 = vmatprep.subr.bf16.mxu0 %v2255_v49 }
  0x76   :  { %2110 = vmatpush3.bf16.msra.mxu1 %v2253_v45 }
  0x77   :  { %1788 = vmatmul.mubr.msk.bf16.vlgmr.msra.gmra.mxu0 %vm2663_vm7, %v1787_v51  ;;  %2115 = vmatprep.subr.bf16.mxu1 %v2254_v50 }
  0x78   :  { %1791 = vmatprep.mubr.msk.bf16.mxu0 %vm2676_vm8, %v1790_v56  ;;  %1963 = vmatpush3.bf16.msra.mxu0 %v2256_v55 }
  0x79   :  { %2112 = vmatmul.mubr.bf16.vlgmr.msra.gmra.mxu1 %v2695_v58  ;;  %1964 = vmatprep.subr.bf16.mxu0 %v2258_v63 }
  0x7a   :  { %2116 = vmatpush3.bf16.msra.mxu1 %v2254_v50 }
  0x7b   :  { %2117 = vmatprep.subr.bf16.mxu1 %v2257_v59 }
  0x7c   :  { %1965 = vmatpush3.bf16.msra.mxu0 %v2259_v0 }
  0x7d   :  { %1966 = vmatprep.subr.bf16.mxu0 %v2261_v2 }
  0x7e   :  { %2118 = vmatpush3.bf16.msra.mxu1 %v2257_v59 }
  0x7f   :  { %1794 = vmatmul.mubr.msk.bf16.gmra.mxu0 %vm2691_vm10, %v1793_v62  ;;  %2119 = vmatprep.subr.bf16.mxu1 %v2260_v1 }
  0x80   :  { %1967 = vmatpush3.bf16.msra.mxu0 %v2262_v3 }
  0x81   :  { %1968 = vmatprep.subr.bf16.mxu0 %v2264_v5 }
  0x82   :  { %2120 = vmatpush3.bf16.msra.mxu1 %v2260_v1 }
  0x83   :  { %2121 = vmatprep.subr.bf16.mxu1 %v2263_v4 }
  0x84   :  { %1969 = vmatpush3.bf16.msra.mxu0 %v2265_v6 }
  0x85   :  { %1970 = vmatprep.subr.bf16.mxu0 %v2267_v8 }
  0x86   :  { %2122 = vmatpush3.bf16.msra.mxu1 %v2263_v4 }
  0x87   :  { %2123 = vmatprep.subr.bf16.mxu1 %v2266_v7 }
  0x88   :  { %1971 = vmatpush3.bf16.msra.mxu0 %v2268_v9 }
  0x89   :  { %1972 = vmatprep.subr.bf16.mxu0 %v2270_v11  ;;  %v2279_v11 = vld [vmem:[#allocation8 + $0x30] sm:$0xff]  }
  0x8a   :  { %2124 = vmatpush3.bf16.msra.mxu1 %v2266_v7 }
  0x8b   :  { %2125 = vmatprep.subr.bf16.mxu1 %v2269_v10 }
  0x8c   :  { %1973 = vmatpush3.bf16.msra.mxu0 %v2271_v12 }
  0x8d   :  { %1974 = vmatprep.subr.bf16.mxu0 %v2273_v15  ;;  %v2280_v15 = vld [vmem:[#allocation8 + $0x28] sm:$0xff]  }
  0x8e   :  { %2126 = vmatpush3.bf16.msra.mxu1 %v2269_v10 }
  0x8f   :  { %2127 = vmatprep.subr.bf16.mxu1 %v2272_v13 }
  0x90   :  { %1975 = vmatpush3.bf16.msra.mxu0 %v2274_v16 }
  0x91   :  { %1976 = vmatprep.subr.bf16.mxu0 %v2276_v18  ;;  %v2281_v18 = vld [vmem:[#allocation8 + $0x20] sm:$0xff]  }
  0x92   :  { %2128 = vmatpush3.bf16.msra.mxu1 %v2272_v13 }
  0x93   :  { %2129 = vmatprep.subr.bf16.mxu1 %v2275_v17 }
  0x94   :  { %1977 = vmatpush3.bf16.msra.mxu0 %v2277_v19  ;;  %v2283_v19 = vld [vmem:[#allocation8 + $0x10] sm:$0xff]  }
  0x95   :  { %2135 = vmatprep.subr.bf16.mxu0 %v2278_v21 }
  0x96   :  { %2130 = vmatpush3.bf16.msra.mxu1 %v2275_v17 }
 0x137   :  { %v1940_v23 = vpop.f32.mrf.mxu0 }
 0x139   :  { %v1941_v24 = vpop.f32.mrf.mxu0  ;;  %v2113_v26 = vpop.f32.mrf.mxu1 }
 0x13a   :  { %v1942_v25 = vadd.f32 %v1941_v24, %v1940_v23  ;;  %v2285_v23 = vld [vmem:[#allocation8] sm:$0xff]   ;;  %v2286_v24 = vld [vmem:[#allocation10 + $0xb8] sm:$0xff]  }
 0x13b   :  { %v1943_v28 = vpop.f32.mrf.mxu0  ;;  %v525_v29 = vpop.f32.mrf.mxu1 }
 0x13c   :  { %v477_v31 = vadd.f32 %v1942_v25, %v1758_v27  ;;  %v2288_v25 = vld [vmem:[#allocation10 + $0x38] sm:$0xff]  }
 0x13d   :  { %v1944_v30 = vpop.f32.mrf.mxu0  ;;  %v2114_v33 = vpop.f32.mrf.mxu1 }
 0x13e   :  { %v1945_v32 = vadd.f32 %v1944_v30, %v1943_v28  ;;  %v526_v39 = vadd.f32 %v525_v29, %v477_v31  ;;  %v2292_v28 = vld [vmem:[#allocation10 + $0xa8] sm:$0xff]   ;;  %v2291_v29 = vld [vmem:[#allocation10 + $0x30] sm:$0xff]   ;;  %v2295_v31 = vld [vmem:[#allocation10 + $0xa0] sm:$0xff]  }
 0x13f   :  { %v1946_v34 = vpop.f32.mrf.mxu0  ;;  %v528_v36 = vpop.f32.mrf.mxu1  ;;  %v2293_v30 = vld [vmem:[#allocation10 + $0x68] sm:$0xff]  }
 0x140   :  { %v480_v35 = vadd.f32 %v1945_v32, %v1758_v27  ;;  %v540_v48 = vmax.f32 %v526_v39, 0.0  ;;  %v2294_v32 = vld [vmem:[#allocation10 + $0x28] sm:$0xff]   ;;  %v2301_v39 = vld [vmem:[#allocation10 + $0x90] sm:$0xff]  }
 0x141   :  { %v1947_v41 = vpop.f32.mrf.mxu0 }
 0x142   :  { %v1948_v42 = vadd.f32 %v1947_v41, %v1946_v34  ;;  %v529_v43 = vadd.f32 %v528_v36, %v480_v35  ;;  %v544_v61 = vrot.slane %v540_v48, 6  ;;  %v556_v62 = vrot.slane %v540_v48, 7  ;;  %v2298_v34 = vld [vmem:[#allocation10 + $0x98] sm:$0xff]   ;;  %v2302_v41 = vld [vmem:[#allocation10 + $0x50] sm:$0xff]  }
 0x143   :  { %v1949_v44 = vpop.f32.mrf.mxu0  ;;  %v2299_v35 = vld [vmem:[#allocation10 + $0x58] sm:$0xff]  }
 0x144   :  { %v485_v45 = vadd.f32 %v1948_v42, %v1758_v27  ;;  %v541_v47 = vmax.f32 %v529_v43, 0.0  ;;  %v2300_v36 = vld [vmem:[#allocation10 + $0x18] sm:$0xff]   ;;  %v2303_v42 = vld [vmem:[#allocation10 + $0x10] sm:$0xff]   ;;  %v2304_v43 = vld [vmem:[#allocation10 + $0x88] sm:$0xff]  }
 0x145   :  { %v1950_v49 = vpop.f32.mrf.mxu0 }
 0x146   :  { %v534_v50 = vadd.f32 %v2113_v26, %v485_v45  ;;  %v1951_v51 = vadd.f32 %v1950_v49, %v1949_v44  ;;  %v570_v52 = vpack.c.bf16 %v541_v47, %v540_v48  ;;  %v545_v56 = vrot.slane %v541_v47, 6  ;;  %v2289_v26 = vld [vmem:[#allocation10 + $0xb0] sm:$0xff]   ;;  %v2305_v44 = vld [vmem:[#allocation10 + $0x48] sm:$0xff]   ;;  %v2308_v48 = vld [vmem:[#allocation10 + $0x40] sm:$0xff]  }
 0x147   :  { %v557_v59 = vrot.slane %v541_v47, 7  ;;  %v2306_v45 = vld [vmem:[#allocation10 + $0x8] sm:$0xff]   ;;  %v2307_v47 = vld [vmem:[#allocation10 + $0x80] sm:$0xff]  }
 0x148   :  { %v488_v53 = vadd.f32 %v1951_v51, %v1758_v27  ;;  %2131 = vmatprep.mubr.bf16.mxu1 %v570_v52  ;;  %v542_v54 = vmax.f32 %v534_v50, 0.0  ;;  %v550_v3 = vsel %vm256_vm0, %v544_v61, %v545_v56  ;;  %v2290_v27 = vld [vmem:[#allocation10 + $0x70] sm:$0xff]   ;;  %v2309_v49 = vld [vmem:[#allocation10] sm:$0xff]   ;;  %v2737_v50 = vld [vmem:[#allocation11 + $0xb8] sm:$0xff]  }
 0x149   :  { %v562_v5 = vsel %vm273_vm2, %v556_v62, %v557_v59 }
 0x14a   :  { %v537_v55 = vadd.f32 %v2114_v33, %v488_v53  ;;  %v558_v63 = vrot.slane %v542_v54, 7  ;;  %v546_v13 = vrot.slane %v542_v54, 6  ;;  %v2297_v33 = vld [vmem:[#allocation10 + $0x20] sm:$0xff]  }
 0x14c   :  { %v543_v60 = vmax.f32 %v537_v55, 0.0  ;;  %v561_v10 = vsel %vm273_vm2, %v557_v59, %v558_v63  ;;  %v549_v17 = vsel %vm256_vm0, %v545_v56, %v546_v13 }
 0x14e   :  { %v547_v0 = vrot.slane %v543_v60, 6  ;;  %v559_v1 = vrot.slane %v543_v60, 7  ;;  %v573_v2 = vpack.c.bf16 %v543_v60, %v542_v54 }
 0x150   :  { %v551_v4 = vsel %vm256_vm0, %v547_v0, %v544_v61  ;;  %2132 = vmatmul.mubr.bf16.vlgmr.msra.gmra.mxu1 %v573_v2  ;;  %v563_v6 = vsel %vm273_vm2, %v559_v1, %v556_v62  ;;  %v560_v7 = vsel %vm273_vm2, %v558_v63, %v559_v1  ;;  %v548_v16 = vsel %vm256_vm0, %v546_v13, %v547_v0  ;;  %v1795_v0 = vld [vmem:[%s2836_s4] ss:$0 sm:$0xff] }
 0x151   :  { %v1824_v8 = vpack.c.bf16 %v550_v3, %v551_v4  ;;  %v1821_v9 = vpack.c.bf16 %v562_v5, %v563_v6  ;;  %v1827_v12 = vpack.c.bf16 %v560_v7, %v561_v10  ;;  %v1830_v37 = vpack.c.bf16 %v548_v16, %v549_v17  ;;  %v1832_v7 = vld [vmem:[%s2838_s6] ss:$0 sm:$0xff] }
 0x153   :  { %1822 = vmatprep.mubr.msk.bf16.mxu0 %vm2652_vm6, %v1821_v9 }
 0x154   :  { %1825 = vmatmul.mubr.msk.bf16.vlgmr.msra.gmra.mxu0 %vm2663_vm7, %v1824_v8 }
 0x155   :  { %2136 = vmatpush3.bf16.msra.mxu0 %v2278_v21  ;;  %1828 = vmatprep.mubr.msk.bf16.mxu0 %vm2676_vm8, %v1827_v12  ;;  %v2284_v21 = vld [vmem:[#allocation8 + $0x8] sm:$0xff]  }
 0x156   :  { %2137 = vmatprep.subr.bf16.mxu0 %v2279_v11 }
 0x159   :  { %2138 = vmatpush3.bf16.msra.mxu0 %v2279_v11 }
 0x15a   :  { %2139 = vmatprep.subr.bf16.mxu0 %v2280_v15 }
 0x15c   :  { %1831 = vmatmul.mubr.msk.bf16.gmra.mxu0 %vm2691_vm10, %v1830_v37 }
 0x15d   :  { %2140 = vmatpush3.bf16.msra.mxu0 %v2280_v15  ;;  %2151 = vmatprep.mubr.bf16.mxu0 %v2656_v38  ;;  %v2287_v38 = vld [vmem:[#allocation10 + $0x78] sm:$0xff]  }
 0x15e   :  { %2141 = vmatprep.subr.bf16.mxu0 %v2281_v18  ;;  %2010 = vmatprep.subr.bf16.mxu1 %v2287_v38 }
 0x15f   :  { %2011 = vmatpush3.bf16.msra.mxu1 %v2288_v25 }
 0x160   :  { %2012 = vmatprep.subr.bf16.mxu1 %v2290_v27 }
 0x161   :  { %2142 = vmatpush3.bf16.msra.mxu0 %v2281_v18 }
 0x162   :  { %2143 = vmatprep.subr.bf16.mxu0 %v2282_v46 }
 0x163   :  { %2013 = vmatpush3.bf16.msra.mxu1 %v2291_v29 }
 0x164   :  { %2014 = vmatprep.subr.bf16.mxu1 %v2293_v30 }
 0x165   :  { %2144 = vmatpush3.bf16.msra.mxu0 %v2282_v46 }
 0x166   :  { %2145 = vmatprep.subr.bf16.mxu0 %v2283_v19 }
 0x167   :  { %2015 = vmatpush3.bf16.msra.mxu1 %v2294_v32 }
 0x169   :  { %2146 = vmatpush3.bf16.msra.mxu0 %v2283_v19 }
 0x16a   :  { %2147 = vmatprep.subr.bf16.mxu0 %v2284_v21 }
 0x16d   :  { %2148 = vmatpush3.bf16.msra.mxu0 %v2284_v21 }
 0x16e   :  { %2149 = vmatprep.subr.bf16.mxu0 %v2285_v23 }
 0x171   :  { %2150 = vmatpush3.bf16.msra.mxu0 %v2285_v23 }
 0x172   :  { %2155 = vmatprep.subr.bf16.mxu0 %v2286_v24 }
 0x174   :  { %2152 = vmatmul.mubr.bf16.vlgmr.msra.gmra.mxu0 %v2695_v58  ;;  %v2296_v58 = vld [vmem:[#allocation10 + $0x60] sm:$0xff]  }
 0x175   :  { %2156 = vmatpush3.bf16.msra.mxu0 %v2286_v24  ;;  %2016 = vmatprep.subr.bf16.mxu1 %v2296_v58 }
 0x176   :  { %2157 = vmatprep.subr.bf16.mxu0 %v2289_v26  ;;  %2017 = vmatpush3.bf16.msra.mxu1 %v2297_v33 }
 0x177   :  { %2018 = vmatprep.subr.bf16.mxu1 %v2299_v35 }
 0x179   :  { %2158 = vmatpush3.bf16.msra.mxu0 %v2289_v26 }
 0x17a   :  { %2159 = vmatprep.subr.bf16.mxu0 %v2292_v28  ;;  %2019 = vmatpush3.bf16.msra.mxu1 %v2300_v36 }
 0x17b   :  { %2020 = vmatprep.subr.bf16.mxu1 %v2302_v41 }
 0x17d   :  { %2160 = vmatpush3.bf16.msra.mxu0 %v2292_v28 }
 0x17e   :  { %2161 = vmatprep.subr.bf16.mxu0 %v2295_v31  ;;  %2021 = vmatpush3.bf16.msra.mxu1 %v2303_v42 }
 0x17f   :  { %2022 = vmatprep.subr.bf16.mxu1 %v2305_v44 }
 0x181   :  { %2162 = vmatpush3.bf16.msra.mxu0 %v2295_v31 }
 0x182   :  { %2163 = vmatprep.subr.bf16.mxu0 %v2298_v34  ;;  %2023 = vmatpush3.bf16.msra.mxu1 %v2306_v45 }
 0x183   :  { %2024 = vmatprep.subr.bf16.mxu1 %v2308_v48 }
 0x185   :  { %2164 = vmatpush3.bf16.msra.mxu0 %v2298_v34 }
 0x186   :  { %2165 = vmatprep.subr.bf16.mxu0 %v2301_v39  ;;  %2025 = vmatpush3.bf16.msra.mxu1 %v2309_v49 }
 0x189   :  { %2166 = vmatpush3.bf16.msra.mxu0 %v2301_v39 }
 0x18a   :  { %2167 = vmatprep.subr.bf16.mxu0 %v2304_v43 }
 0x18d   :  { %2168 = vmatpush3.bf16.msra.mxu0 %v2304_v43 }
 0x18e   :  { %2169 = vmatprep.subr.bf16.mxu0 %v2307_v47 }
 0x191   :  { %2170 = vmatpush3.bf16.msra.mxu0 %v2307_v47 }
 0x192   :  { %2175 = vmatprep.subr.bf16.mxu0 %v2737_v50 }
 0x210   :  { %v2133_v61 = vpop.f32.mrf.mxu1 }
 0x212   :  { %v807_v2 = vpop.f32.mrf.mxu1 }
 0x214   :  { %v1978_v51 = vpop.f32.mrf.mxu0  ;;  %v2134_v8 = vpop.f32.mrf.mxu1 }
 0x216   :  { %v1979_v52 = vpop.f32.mrf.mxu0  ;;  %v810_v17 = vpop.f32.mrf.mxu1 }
 0x217   :  { %v1980_v62 = vadd.f32 %v1979_v52, %v1978_v51 }
 0x218   :  { %v1981_v53 = vpop.f32.mrf.mxu0 }
 0x219   :  { %v759_v3 = vadd.f32 %v1980_v62, %v1795_v0 }
 0x21a   :  { %v1982_v54 = vpop.f32.mrf.mxu0 }
 0x21b   :  { %v1983_v5 = vadd.f32 %v1982_v54, %v1981_v53  ;;  %v808_v9 = vadd.f32 %v807_v2, %v759_v3  ;;  %v2315_v2 = vld [vmem:[#allocation11 + $0xa8] sm:$0xff]   ;;  %v2316_v3 = vld [vmem:[#allocation11 + $0x30] sm:$0xff]  }
 0x21c   :  { %v1984_v55 = vpop.f32.mrf.mxu0  ;;  %v2335_v53 = vld [vmem:[#allocation13 + $0x30] sm:$0xff]  }
 0x21d   :  { %v762_v11 = vadd.f32 %v1983_v5, %v1795_v0  ;;  %v822_v18 = vmax.f32 %v808_v9, 0.0  ;;  %v2318_v5 = vld [vmem:[#allocation11 + $0xa0] sm:$0xff]  }
 0x21e   :  { %v1985_v56 = vpop.f32.mrf.mxu0  ;;  %v2322_v9 = vld [vmem:[#allocation11 + $0x20] sm:$0xff]  }
 0x21f   :  { %v1986_v63 = vadd.f32 %v1985_v56, %v1984_v55  ;;  %v811_v19 = vadd.f32 %v810_v17, %v762_v11  ;;  %v2324_v11 = vld [vmem:[#allocation11 + $0x90] sm:$0xff]   ;;  %v2329_v17 = vld [vmem:[#allocation11 + $0x48] sm:$0xff]  }
 0x220   :  { %v1987_v59 = vpop.f32.mrf.mxu0 }
 0x221   :  { %v767_v4 = vadd.f32 %v1986_v63, %v1795_v0  ;;  %v823_v28 = vmax.f32 %v811_v19, 0.0  ;;  %v2311_v63 = vld [vmem:[#allocation11 + $0x78] sm:$0xff]   ;;  %v2333_v19 = vld [vmem:[#allocation11] sm:$0xff]  }
 0x222   :  { %v1988_v60 = vpop.f32.mrf.mxu0  ;;  %2048 = vmatprep.subr.bf16.mxu1 %v2311_v63 }
 0x223   :  { %v1989_v1 = vadd.f32 %v1988_v60, %v1987_v59  ;;  %v816_v10 = vadd.f32 %v2133_v61, %v767_v4  ;;  %v2317_v4 = vld [vmem:[#allocation11 + $0x68] sm:$0xff]  }
 0x225   :  { %v770_v6 = vadd.f32 %v1989_v1, %v1795_v0  ;;  %v824_v37 = vmax.f32 %v816_v10, 0.0  ;;  %v2312_v0 = vld [vmem:[#allocation11 + $0xb0] sm:$0xff]   ;;  %v2313_v1 = vld [vmem:[#allocation11 + $0x38] sm:$0xff]  }
 0x226   :  { %v2323_v10 = vld [vmem:[#allocation11 + $0x58] sm:$0xff]  }
 0x227   :  { %v819_v13 = vadd.f32 %v2134_v8, %v770_v6  ;;  %v2319_v6 = vld [vmem:[#allocation11 + $0x28] sm:$0xff]   ;;  %v2321_v8 = vld [vmem:[#allocation11 + $0x98] sm:$0xff]  }
 0x229   :  { %v825_v38 = vmax.f32 %v819_v13, 0.0  ;;  %v2326_v13 = vld [vmem:[#allocation11 + $0x50] sm:$0xff]  }
 0x234   :  { %v2153_v12 = vpop.f32.mrf.mxu0 }
 0x235   :  { %v940_v15 = vadd.f32 %v2153_v12, %v1832_v7  ;;  %v2325_v12 = vld [vmem:[#allocation11 + $0x18] sm:$0xff]  }
 0x236   :  { %v931_v16 = vpop.f32.mrf.mxu0 }
 0x237   :  { %v932_v46 = vadd.f32 %v1832_v7, %v931_v16  ;;  %v948_v23 = vadd.f32 %v940_v15, %v824_v37  ;;  %v2327_v15 = vld [vmem:[#allocation11 + $0x88] sm:$0xff]   ;;  %v2328_v16 = vld [vmem:[#allocation11 + $0x10] sm:$0xff]   ;;  %v2330_v37 = vld [vmem:[#allocation11 + $0x80] sm:$0xff]  }
 0x238   :  { %v2154_v21 = vpop.f32.mrf.mxu0 }
 0x239   :  { %v946_v24 = vadd.f32 %v932_v46, %v822_v18  ;;  %v943_v25 = vadd.f32 %v2154_v21, %v1832_v7  ;;  %v952_v30 = vmax.f32 %v948_v23, 0.0  ;;  %v2331_v18 = vld [vmem:[#allocation11 + $0x8] sm:$0xff]   ;;  %v2332_v46 = vld [vmem:[#allocation11 + $0x40] sm:$0xff]  }
 0x23a   :  { %v934_v26 = vpop.f32.mrf.mxu0 }
 0x23b   :  { %v949_v27 = vadd.f32 %v943_v25, %v825_v38  ;;  %v935_v29 = vadd.f32 %v1832_v7, %v934_v26  ;;  %v950_v31 = vmax.f32 %v946_v24, 0.0  ;;  %v1071_v36 = vrot.slane %v952_v30, 6  ;;  %v2320_v7 = vld [vmem:[#allocation11 + $0x60] sm:$0xff]  }
 0x23c   :  { %v1054_v59 = vrot.slane %v952_v30, 4  ;;  %v1841_v25 = vld [vmem:[%s2840_s8] ss:$0 sm:$0xff] }
 0x23d   :  { %v2746_v32 = vmax.f32 %v949_v27, 0.0  ;;  %v947_v58 = vadd.f32 %v935_v29, %v823_v28  ;;  %v1069_v39 = vrot.slane %v950_v31, 6  ;;  %v1052_v41 = vrot.slane %v950_v31, 4 }
 0x23f   :  { %v1072_v33 = vrot.slane %v2746_v32, 6  ;;  %v1055_v34 = vrot.slane %v2746_v32, 4  ;;  %v2750_v35 = vmax.f32 %v947_v58, 0.0  ;;  %v1086_v45 = vpack.c.bf16 %v2746_v32, %v952_v30 }
 0x241   :  { %v1053_v42 = vrot.slane %v2750_v35, 4  ;;  %v1070_v43 = vrot.slane %v2750_v35, 6  ;;  %v1083_v44 = vpack.c.bf16 %v2750_v35, %v950_v31  ;;  %v1076_v47 = vsel %vm256_vm0, %v1072_v33, %v1069_v39 }
 0x242   :  { %v1060_v20 = vsel %vm1056_vm11, %v1055_v34, %v1052_v41  ;;  %v1073_v55 = vsel %vm256_vm0, %v1071_v36, %v1072_v33  ;;  %v1057_v61 = vsel %vm1056_vm11, %v1054_v59, %v1055_v34 }
 0x243   :  { %2171 = vmatprep.mubr.bf16.mxu0 %v1083_v44  ;;  %v1075_v48 = vsel %vm256_vm0, %v1069_v39, %v1070_v43  ;;  %v1059_v49 = vsel %vm1056_vm11, %v1052_v41, %v1053_v42  ;;  %v1074_v51 = vsel %vm256_vm0, %v1070_v43, %v1071_v36  ;;  %v1058_v60 = vsel %vm1056_vm11, %v1053_v42, %v1054_v59 }
 0x244   :  { %2172 = vmatmul.mubr.bf16.vlgmr.msra.gmra.mxu0 %v1086_v45  ;;  %v1867_v52 = vpack.c.bf16 %v1075_v48, %v1076_v47  ;;  %v1870_v54 = vpack.c.bf16 %v1059_v49, %v1060_v20  ;;  %v1873_v56 = vpack.c.bf16 %v1073_v55, %v1074_v51  ;;  %v1876_v62 = vpack.c.bf16 %v1057_v61, %v1058_v60 }
 0x245   :  { %2176 = vmatpush3.bf16.msra.mxu0 %v2737_v50  ;;  %v2340_v50 = vld [vmem:[#allocation13 + $0x8] sm:$0xff]  }
 0x246   :  { %1868 = vmatprep.mubr.msk.bf16.mxu1 %vm2663_vm7, %v1867_v52  ;;  %2177 = vmatprep.subr.bf16.mxu0 %v2312_v0 }
 0x247   :  { %1871 = vmatmul.mubr.msk.bf16.vlgmr.msra.gmra.mxu1 %vm2769_vm13, %v1870_v54 }
 0x248   :  { %1874 = vmatprep.mubr.msk.bf16.mxu1 %vm2691_vm10, %v1873_v56  ;;  %2049 = vmatpush3.bf16.msra.mxu1 %v2313_v1 }
 0x249   :  { %2178 = vmatpush3.bf16.msra.mxu0 %v2312_v0  ;;  %2050 = vmatprep.subr.bf16.mxu1 %v2314_v22 }
 0x24a   :  { %2179 = vmatprep.subr.bf16.mxu0 %v2315_v2 }
 0x24c   :  { %2051 = vmatpush3.bf16.msra.mxu1 %v2316_v3 }
 0x24d   :  { %2180 = vmatpush3.bf16.msra.mxu0 %v2315_v2  ;;  %2052 = vmatprep.subr.bf16.mxu1 %v2317_v4 }
 0x24e   :  { %2181 = vmatprep.subr.bf16.mxu0 %v2318_v5 }
 0x24f   :  { %1877 = vmatmul.mubr.msk.bf16.gmra.mxu1 %vm2788_vm15, %v1876_v62 }
 0x250   :  { %2053 = vmatpush3.bf16.msra.mxu1 %v2319_v6 }
 0x251   :  { %2182 = vmatpush3.bf16.msra.mxu0 %v2318_v5  ;;  %2054 = vmatprep.subr.bf16.mxu1 %v2320_v7 }
 0x252   :  { %2183 = vmatprep.subr.bf16.mxu0 %v2321_v8 }
 0x254   :  { %2055 = vmatpush3.bf16.msra.mxu1 %v2322_v9 }
 0x255   :  { %2184 = vmatpush3.bf16.msra.mxu0 %v2321_v8  ;;  %2056 = vmatprep.subr.bf16.mxu1 %v2323_v10 }
 0x256   :  { %2185 = vmatprep.subr.bf16.mxu0 %v2324_v11 }
 0x258   :  { %2057 = vmatpush3.bf16.msra.mxu1 %v2325_v12 }
 0x259   :  { %2186 = vmatpush3.bf16.msra.mxu0 %v2324_v11  ;;  %2058 = vmatprep.subr.bf16.mxu1 %v2326_v13 }
 0x25a   :  { %2187 = vmatprep.subr.bf16.mxu0 %v2327_v15 }
 0x25c   :  { %2059 = vmatpush3.bf16.msra.mxu1 %v2328_v16  ;;  %v2524_v16 = vmov 0.0  }
 0x25d   :  { %2188 = vmatpush3.bf16.msra.mxu0 %v2327_v15  ;;  %2060 = vmatprep.subr.bf16.mxu1 %v2329_v17  ;;  %v2337_v17 = vld [vmem:[#allocation13 + $0x20] sm:$0xff]  }
 0x25e   :  { %2189 = vmatprep.subr.bf16.mxu0 %v2330_v37 }
 0x260   :  { %2061 = vmatpush3.bf16.msra.mxu1 %v2331_v18  ;;  %v2341_v18 = vld [vmem:[#allocation13] sm:$0xff]  }
 0x261   :  { %2190 = vmatpush3.bf16.msra.mxu0 %v2330_v37  ;;  %2062 = vmatprep.subr.bf16.mxu1 %v2332_v46  ;;  %v2339_v37 = vld [vmem:[#allocation13 + $0x10] sm:$0xff]  }
 0x264   :  { %2063 = vmatpush3.bf16.msra.mxu1 %v2333_v19 }
 0x265   :  { %2195 = vmatprep.subr.bf16.mxu1 %v2524_v16 }
 0x304   :  { %v2173_v21 = vpop.f32.mrf.mxu0 }
 0x306   :  { %v1320_v24 = vpop.f32.mrf.mxu0 }
 0x307   :  { %v2026_v23 = vpop.f32.mrf.mxu1 }
 0x308   :  { %v2174_v28 = vpop.f32.mrf.mxu0 }
 0x309   :  { %v2027_v38 = vpop.f32.mrf.mxu1 }
 0x30a   :  { %v2028_v26 = vadd.f32 %v2027_v38, %v2026_v23  ;;  %v1323_v36 = vpop.f32.mrf.mxu0 }
 0x30b   :  { %v2029_v27 = vpop.f32.mrf.mxu1 }
 0x30c   :  { %v1272_v29 = vadd.f32 %v2028_v26, %v1841_v25 }
 0x30d   :  { %v2030_v30 = vpop.f32.mrf.mxu1 }
 0x30e   :  { %v2031_v31 = vadd.f32 %v2030_v30, %v2029_v27  ;;  %v1321_v34 = vadd.f32 %v1320_v24, %v1272_v29 }
 0x30f   :  { %v2032_v58 = vpop.f32.mrf.mxu1 }
 0x310   :  { %v1275_v33 = vadd.f32 %v2031_v31, %v1841_v25  ;;  %v1335_v47 = vmax.f32 %v1321_v34, 0.0 }
 0x311   :  { %v2033_v39 = vpop.f32.mrf.mxu1 }
 0x312   :  { %v1324_v41 = vadd.f32 %v1323_v36, %v1275_v33  ;;  %v2034_v42 = vadd.f32 %v2033_v39, %v2032_v58  ;;  %v1339_v61 = vrot.slane %v1335_v47, 4  ;;  %v1351_v62 = vrot.slane %v1335_v47, 6 }
 0x313   :  { %v2035_v43 = vpop.f32.mrf.mxu1 }
 0x314   :  { %v1336_v44 = vmax.f32 %v1324_v41, 0.0  ;;  %v1280_v45 = vadd.f32 %v2034_v42, %v1841_v25 }
 0x315   :  { %v2036_v48 = vpop.f32.mrf.mxu1 }
 0x316   :  { %v1329_v49 = vadd.f32 %v2173_v21, %v1280_v45  ;;  %v2037_v20 = vadd.f32 %v2036_v48, %v2035_v43  ;;  %v1365_v51 = vpack.c.bf16 %v1336_v44, %v1335_v47  ;;  %v1340_v56 = vrot.slane %v1336_v44, 4 }
 0x317   :  { %v1352_v59 = vrot.slane %v1336_v44, 6 }
 0x318   :  { %v1283_v52 = vadd.f32 %v2037_v20, %v1841_v25  ;;  %2191 = vmatprep.mubr.bf16.mxu0 %v1365_v51  ;;  %v1337_v54 = vmax.f32 %v1329_v49, 0.0  ;;  %v1345_v2 = vsel %vm1056_vm11, %v1339_v61, %v1340_v56  ;;  %v1878_v25 = vld [vmem:[%s2842_s10] ss:$0 sm:$0xff] }
 0x319   :  { %v1357_v4 = vsel %vm256_vm0, %v1351_v62, %v1352_v59 }
 0x31a   :  { %v1332_v55 = vadd.f32 %v2174_v28, %v1283_v52  ;;  %v1353_v63 = vrot.slane %v1337_v54, 6  ;;  %v1341_v11 = vrot.slane %v1337_v54, 4 }
 0x31c   :  { %v1338_v60 = vmax.f32 %v1332_v55, 0.0  ;;  %v1356_v9 = vsel %vm256_vm0, %v1352_v59, %v1353_v63  ;;  %v1344_v13 = vsel %vm1056_vm11, %v1340_v56, %v1341_v11 }
 0x31e   :  { %v1342_v0 = vrot.slane %v1338_v60, 4  ;;  %v1354_v1 = vrot.slane %v1338_v60, 6  ;;  %v1368_v22 = vpack.c.bf16 %v1338_v60, %v1337_v54  ;;  %v1915_v54 = vld [vmem:[%s2844_s12] ss:$0 sm:$0xff] }
 0x320   :  { %v1346_v3 = vsel %vm1056_vm11, %v1342_v0, %v1339_v61  ;;  %2192 = vmatmul.mubr.bf16.vlgmr.msra.gmra.mxu0 %v1368_v22  ;;  %v1358_v5 = vsel %vm256_vm0, %v1354_v1, %v1351_v62  ;;  %v1355_v6 = vsel %vm256_vm0, %v1353_v63, %v1354_v1  ;;  %v1343_v12 = vsel %vm1056_vm11, %v1341_v11, %v1342_v0 }
 0x321   :  { %v1907_v7 = vpack.c.bf16 %v1345_v2, %v1346_v3  ;;  %v1904_v8 = vpack.c.bf16 %v1357_v4, %v1358_v5  ;;  %v1910_v10 = vpack.c.bf16 %v1355_v6, %v1356_v9  ;;  %v1913_v15 = vpack.c.bf16 %v1343_v12, %v1344_v13 }
 0x322   :  { %vm2525_vm0 = vmmov 0  }
 0x323   :  { %1905 = vmatprep.mubr.msk.bf16.mxu1 %vm2663_vm7, %v1904_v8 }
 0x324   :  { %1908 = vmatmul.mubr.msk.bf16.vlgmr.msra.gmra.mxu1 %vm2769_vm13, %v1907_v7 }
 0x325   :  { %1911 = vmatprep.mubr.msk.bf16.mxu1 %vm2691_vm10, %v1910_v10  ;;  %2196 = vmatpush3.bf16.msra.mxu1 %v2334_v40 }
 0x326   :  { %2197 = vmatprep.subr.bf16.mxu1 %v2524_v16 }
 0x329   :  { %2198 = vmatpush3.bf16.msra.mxu1 %v2335_v53 }
 0x32a   :  { %2199 = vmatprep.subr.bf16.mxu1 %v2524_v16 }
 0x32c   :  { %1914 = vmatmul.mubr.msk.bf16.gmra.mxu1 %vm2788_vm15, %v1913_v15 }
 0x32d   :  { %2200 = vmatpush3.bf16.msra.mxu1 %v2336_v57  ;;  %2211 = vmatprep.mubr.msk.bf16.mxu1 %vm2525_vm0, %v2524_v16 }
 0x32e   :  { %2201 = vmatprep.subr.bf16.mxu1 %v2524_v16 }
 0x331   :  { %2202 = vmatpush3.bf16.msra.mxu1 %v2337_v17 }
 0x332   :  { %2203 = vmatprep.subr.bf16.mxu1 %v2524_v16 }
 0x335   :  { %2204 = vmatpush3.bf16.msra.mxu1 %v2338_v14 }
 0x336   :  { %2205 = vmatprep.subr.bf16.mxu1 %v2524_v16 }
 0x339   :  { %2206 = vmatpush3.bf16.msra.mxu1 %v2339_v37 }
 0x33a   :  { %2207 = vmatprep.subr.bf16.mxu1 %v2524_v16 }
 0x33d   :  { %2208 = vmatpush3.bf16.msra.mxu1 %v2340_v50 }
 0x33e   :  { %2209 = vmatprep.subr.bf16.mxu1 %v2524_v16 }
 0x341   :  { %2210 = vmatpush3.bf16.msra.mxu1 %v2341_v18 }
 0x3e0   :  { %v2193_v46 = vpop.f32.mrf.mxu0 }
 0x3e2   :  { %v1600_v19 = vpop.f32.mrf.mxu0 }
 0x3e4   :  { %v2064_v21 = vpop.f32.mrf.mxu1  ;;  %v2194_v38 = vpop.f32.mrf.mxu0 }
 0x3e6   :  { %v2065_v23 = vpop.f32.mrf.mxu1  ;;  %v1602_v30 = vpop.f32.mrf.mxu0 }
 0x3e8   :  { %v2067_v24 = vpop.f32.mrf.mxu1 }
 0x3ea   :  { %v2068_v26 = vpop.f32.mrf.mxu1 }
 0x3eb   :  { %v2069_v27 = vadd.f32 %v2068_v26, %v2067_v24 }
 0x3ec   :  { %v2070_v28 = vpop.f32.mrf.mxu1 }
 0x3ed   :  { %v1556_v29 = vadd.f32 %v2069_v27, %v1878_v25 }
 0x3ee   :  { %v2071_v31 = vpop.f32.mrf.mxu1 }
 0x3ef   :  { %v1603_v58 = vadd.f32 %v1602_v30, %v1556_v29 }
 0x3f0   :  { %v2073_v33 = vpop.f32.mrf.mxu1 }
 0x3f1   :  { %v1613_v36 = vmax.f32 %v1603_v58, 0.0 }
 0x3f2   :  { %v2074_v34 = vpop.f32.mrf.mxu1 }
 0x3f3   :  { %v2075_v39 = vadd.f32 %v2074_v34, %v2073_v33  ;;  %v1615_v42 = vadd.f32 %v1613_v36, %v2750_v35 }
 0x3f5   :  { %v1563_v41 = vadd.f32 %v2075_v39, %v1878_v25  ;;  %v1617_v45 = vmax.f32 %v1615_v42, 0.0 }
 0x3f7   :  { %v1610_v43 = vadd.f32 %v2194_v38, %v1563_v41  ;;  %v1637_v49 = vrot.slane %v1617_v45, 7 }
 0x3f9   :  { %v1614_v44 = vmax.f32 %v1610_v43, 0.0 }
 0x3fb   :  { %v1616_v47 = vadd.f32 %v1614_v44, %v2746_v32 }
 0x3fd   :  { %v1618_v48 = vmax.f32 %v1616_v47, 0.0 }
 0x3ff   :  { %v1640_v20 = vrot.slane %v1618_v48, 6 }
 0x401   :  { %v1643_v51 = vsel %vm1642_vm1, %v1637_v49, %v1640_v20 }
 0x402   :  { %v1644_v52 = vpack.c.bf16 %v1643_v51, %v1643_v51 }
 0x404   :  { %2212 = vmatmul.mubr.bf16.vlgmr.msra.gmra.mxu1 %v1644_v52 }
 0x4c4   :  { %v1733_v55 = vpop.f32.mrf.mxu1 }
 0x4c5   :  { %v1734_v35 = vadd.f32 %v1915_v54, %v1733_v55 }
 0x4c6   :  { %v2213_v56 = vpop.f32.mrf.mxu1 }
 0x4c7   :  { %1739 = vst [vmem:[#allocation14] sm:$0x3] %v1734_v35 }
 0x4c8   :  { %v1736_v59 = vpop.f32.mrf.mxu1 }
 0x4c9   :  { %2493 = shalt.err (!%p2490_p11)
}
 0x4ca   :  { %1749 = dma.vmem_to_hbm [thread:$0]  %s1747_s14, 32, %s2845_s13, [#allocation4]   ;;  %v2214_v32 = vpop.f32.mrf.mxu1 }
 0x4cb   :  { %2510 = dma.done.wait [#allocation4], 32  }
 0x4cc   :  { %2511 = vsyncadd [#allocation4], 4294967264 }
 0x4cd   :  { %1753 = vsyncpa [#allocation3], 1 }
 0x4ce   :  { %1754 = vsyncpa [#allocation6], 1 }
 0x4cf   :  { %1755 = vsyncpa [#allocation9], 1 }
 0x4d0   :  { %1756 = vsyncpa [#allocation12], 1 }
 0x4d1   :  { %1757 = vsyncpa [#allocation4], 1 }

</bundles_post_ra>
